<compile_context>
chip_gen: v7x
topology: tpu7x:2x2x1
jax: 0.10.0
libtpu: 0.0.40
codegen_flags: <defaults>
</compile_context>

<pallas_src>
import functools

import jax
import jax.numpy as jnp
from jax.experimental import pallas as pl
from jax.experimental.pallas import tpu as pltpu


# ---------------------------------------------------------------------------
# Helpers
# ---------------------------------------------------------------------------
def _round_up(v, m):
    return (v + m - 1) // m * m


def _pad_to(a, target_shape, value=0.0):
    pads = [(0, t - s) for s, t in zip(a.shape, target_shape)]
    return jnp.pad(a, pads, constant_values=value)


# ---------------------------------------------------------------------------
# Pallas kernel: fused 5-layer ensemble MLP for an (EB, TN) block per grid step.
# ---------------------------------------------------------------------------
def _ensemble_mlp_kernel(
    x_ref,
    w1_ref, b1_ref,
    w2_ref, b2_ref,
    w3_ref, b3_ref,
    w4_ref, b4_ref,
    w5m_ref, b5m_ref,
    w5v_ref, b5v_ref,
    max_lv_ref, min_lv_ref,
    mean_ref, second_ref,
    *, apply_exp,
):
    # (EB, TN, Din_pad): bf16 operands into the MXU, f32 accumulation.
    x = x_ref[...].astype(jnp.bfloat16)

    def fc(h_bf16, w_ref, b_ref):
        z = jnp.einsum(
            "bnd,bdo->bno", h_bf16, w_ref[...],
            preferred_element_type=jnp.float32,
        )
        return z + b_ref[...]          # (EB, 1, O) broadcasts over TN

    def swish_bf16(z_f32):
        # element-wise math in f32, only the matmul operand is narrowed
        return (z_f32 * jax.nn.sigmoid(z_f32)).astype(jnp.bfloat16)

    h = swish_bf16(fc(x, w1_ref, b1_ref))
    h = swish_bf16(fc(h, w2_ref, b2_ref))
    h = swish_bf16(fc(h, w3_ref, b3_ref))
    h = swish_bf16(fc(h, w4_ref, b4_ref))

    mean = fc(h, w5m_ref, b5m_ref)       # (EB, TN, out_pad)  f32
    raw_lv = fc(h, w5v_ref, b5v_ref)     # (EB, TN, out_pad)  f32

    max_lv = max_lv_ref[...]             # (1, out_pad) -> broadcasts
    min_lv = min_lv_ref[...]
    logvar = max_lv - jax.nn.softplus(max_lv - raw_lv)
    logvar = min_lv + jax.nn.softplus(logvar - min_lv)

    mean_ref[...] = mean.astype(mean_ref.dtype)
    if apply_exp:
        # fused variance (exp rides the EUP slot; data already in vregs)
        second_ref[...] = jnp.exp(logvar).astype(second_ref.dtype)
    else:
        second_ref[...] = logvar.astype(second_ref.dtype)


# ---------------------------------------------------------------------------
# One-time parameter preparation: lane-pad to multiples of 128, split w5/b5
# into mean/logvar halves, pre-cast weights to bf16.
# ---------------------------------------------------------------------------
def prepare_padded_params(params, output_dim):
    E, d_in, hidden = params["w1"].shape
    din_pad = _round_up(d_in, 128)
    hidden_pad = _round_up(hidden, 128)
    out_pad = _round_up(output_dim, 128)

    def wpad(w, dp, op):
        return _pad_to(w, (E, dp, op)).astype(jnp.bfloat16)

    def bpad(b, op):
        return _pad_to(b[:, None, :], (E, 1, op)).astype(jnp.float32)

    w5 = params["w5"]
    b5 = params["b5"]
    padded = {
        "w1": wpad(params["w1"], din_pad, hidden_pad),
        "b1": bpad(params["b1"], hidden_pad),
        "w2": wpad(params["w2"], hidden_pad, hidden_pad),
        "b2": bpad(params["b2"], hidden_pad),
        "w3": wpad(params["w3"], hidden_pad, hidden_pad),
        "b3": bpad(params["b3"], hidden_pad),
        "w4": wpad(params["w4"], hidden_pad, hidden_pad),
        "b4": bpad(params["b4"], hidden_pad),
        "w5m": wpad(w5[:, :, :output_dim], hidden_pad, out_pad),
        "b5m": bpad(b5[:, :output_dim], out_pad),
        "w5v": wpad(w5[:, :, output_dim:], hidden_pad, out_pad),
        "b5v": bpad(b5[:, output_dim:], out_pad),
        # pad with the real clamp values so padded lanes stay bounded/finite
        "max_logvar": _pad_to(params["max_logvar"], (1, out_pad), 0.5).astype(jnp.float32),
        "min_logvar": _pad_to(params["min_logvar"], (1, out_pad), -10.0).astype(jnp.float32),
    }
    meta = dict(E=E, d_in=d_in, hidden=hidden, output_dim=output_dim,
                din_pad=din_pad, hidden_pad=hidden_pad, out_pad=out_pad)
    return padded, meta


# ---------------------------------------------------------------------------
# Forward wrapper (matches EnsembleModel.forward semantics).
# ---------------------------------------------------------------------------
def ensemble_model_forward(x, padded, meta, *, reward_size,
                           mode="rs", ret_log_var=False, n_tile=512):
    E, N, d_in = x.shape
    assert E == meta["E"] and d_in == meta["d_in"]
    output_dim = meta["output_dim"]
    din_pad, hidden_pad, out_pad = meta["din_pad"], meta["hidden_pad"], meta["out_pad"]

    # --- choose batch tile (TN) and ensemble block (EB) -------------------
    if N <= n_tile:
        tn = _round_up(N, 8)          # sublane-aligned, single N tile
        n_pad = tn
    else:
        tn = n_tile                   # 512-row tiles: amortizes grid overhead,
        n_pad = _round_up(N, tn)      # fits v7x 64 MiB VMEM with double buffering
    n_tiles = n_pad // tn
    # Collapse the grid for tiny problems: process all members in one step.
    eb = E if (n_tiles == 1 and E <= 8) else 1
    e_blocks = E // eb

    x_p = _pad_to(x.astype(jnp.float32), (E, n_pad, din_pad))

    def xmap(e, n): return (e, n, 0)      # x / outputs: depends on both axes
    def wmap(e, n): return (e, 0, 0)      # weights/biases: resident across N tiles
    def smap(e, n): return (0, 0)         # shared max/min logvar

    in_specs = [
        pl.BlockSpec((eb, tn, din_pad), xmap),                 # x
        pl.BlockSpec((eb, din_pad, hidden_pad), wmap),         # w1
        pl.BlockSpec((eb, 1, hidden_pad), wmap),               # b1
        pl.BlockSpec((eb, hidden_pad, hidden_pad), wmap),      # w2
        pl.BlockSpec((eb, 1, hidden_pad), wmap),               # b2
        pl.BlockSpec((eb, hidden_pad, hidden_pad), wmap),      # w3
        pl.BlockSpec((eb, 1, hidden_pad), wmap),               # b3
        pl.BlockSpec((eb, hidden_pad, hidden_pad), wmap),      # w4
        pl.BlockSpec((eb, 1, hidden_pad), wmap),               # b4
        pl.BlockSpec((eb, hidden_pad, out_pad), wmap),         # w5 (mean half)
        pl.BlockSpec((eb, 1, out_pad), wmap),                  # b5 (mean half)
        pl.BlockSpec((eb, hidden_pad, out_pad), wmap),         # w5 (logvar half)
        pl.BlockSpec((eb, 1, out_pad), wmap),                  # b5 (logvar half)
        pl.BlockSpec((1, out_pad), smap),                      # max_logvar (shared)
        pl.BlockSpec((1, out_pad), smap),                      # min_logvar (shared)
    ]
    out_specs = (
        pl.BlockSpec((eb, tn, out_pad), xmap),                 # mean (lane-dense)
        pl.BlockSpec((eb, tn, out_pad), xmap),                 # var / logvar (lane-dense)
    )
    out_shape = (
        jax.ShapeDtypeStruct((E, n_pad, out_pad), jnp.float32),
        jax.ShapeDtypeStruct((E, n_pad, out_pad), jnp.float32),
    )

    kernel = functools.partial(_ensemble_mlp_kernel, apply_exp=not ret_log_var)

    mean_p, second_p = pl.pallas_call(
        kernel,
        out_shape=out_shape,
        grid_spec=pl.GridSpec(
            grid=(e_blocks, n_tiles),
            in_specs=in_specs,
            out_specs=out_specs,
        ),
        compiler_params=pltpu.CompilerParams(
            dimension_semantics=("parallel", "parallel"),
            vmem_limit_bytes=32 * 1024 * 1024,   # safe on v5e/v6e/v7x; tiles are << this
        ),
    )(
        x_p,
        padded["w1"], padded["b1"],
        padded["w2"], padded["b2"],
        padded["w3"], padded["b3"],
        padded["w4"], padded["b4"],
        padded["w5m"], padded["b5m"],
        padded["w5v"], padded["b5v"],
        padded["max_logvar"], padded["min_logvar"],
    )

    # Strip lane / batch padding; padded lanes never reach the user.
    mean = mean_p[:, :N, :output_dim]
    second = second_p[:, :N, :output_dim]   # var if apply_exp else logvar

    if mode == "rs":
        return mean, second
    elif mode == "s":
        return mean[:, :, reward_size:], second[:, :, reward_size:]
    elif mode == "r":
        return mean[:, :, :reward_size], second[:, :, :reward_size]
    else:
        raise ValueError(mode)


# ---------------------------------------------------------------------------
# Deterministic parameter initialization (mirrors init_weights: truncated normal
# with std = 1/(2*sqrt(in_features)), bias = 0; max/min logvar as in __init__).
# ---------------------------------------------------------------------------
def init_ensemble_params(key, state_size, action_size, reward_size,
                         ensemble_size, hidden_size):
    output_dim = state_size + reward_size
    in_dim = state_size + action_size
    layer_dims = [
        (in_dim, hidden_size),
        (hidden_size, hidden_size),
        (hidden_size, hidden_size),
        (hidden_size, hidden_size),
        (hidden_size, 2 * output_dim),
    ]
    params = {}
    keys = jax.random.split(key, len(layer_dims))
    for i, ((din, dout), k) in enumerate(zip(layer_dims, keys), start=1):
        std = 1.0 / (2.0 * jnp.sqrt(float(din)))
        w = jax.random.truncated_normal(k, -2.0, 2.0, (ensemble_size, din, dout),
                                        dtype=jnp.float32) * std
        b = jnp.zeros((ensemble_size, dout), dtype=jnp.float32)
        params[f"w{i}"] = w
        params[f"b{i}"] = b
    params["max_logvar"] = jnp.ones((1, output_dim), dtype=jnp.float32) / 2.0
    params["min_logvar"] = -jnp.ones((1, output_dim), dtype=jnp.float32) * 10.0
    return params, output_dim


# ---------------------------------------------------------------------------
# Pure-JAX references.  bf16=True mirrors the kernel numerics (bf16 matmul
# operands, f32 accumulation); bf16=False is the exact f32 module semantics.
# ---------------------------------------------------------------------------
def _reference_forward(x, params, output_dim, *, bf16):
    cdt = jnp.bfloat16 if bf16 else jnp.float32

    def fc(h, w, b):
        return jnp.einsum("end,edo->eno", h.astype(cdt), w.astype(cdt),
                          preferred_element_type=jnp.float32) + b[:, None, :]

    def swish(z):
        return z * jax.nn.sigmoid(z)

    h = swish(fc(x, params["w1"], params["b1"]))
    h = swish(fc(h, params["w2"], params["b2"]))
    h = swish(fc(h, params["w3"], params["b3"]))
    h = swish(fc(h, params["w4"], params["b4"]))
    z5 = fc(h, params["w5"], params["b5"])
    mean = z5[:, :, :output_dim]
    logvar = params["max_logvar"] - jax.nn.softplus(params["max_logvar"] - z5[:, :, output_dim:])
    logvar = params["min_logvar"] + jax.nn.softplus(logvar - params["min_logvar"])
    return mean, jnp.exp(logvar)


if __name__ == "__main__":
    # Small deterministic config (toy sizes; hidden=200 / N=50k in production).
    state_size = 8
    action_size = 4
    reward_size = 1
    ensemble_size = 4
    hidden_size = 32
    N = 8  # batch per ensemble member

    key = jax.random.PRNGKey(0)
    k_params, k_x, k_x2 = jax.random.split(key, 3)

    params, output_dim = init_ensemble_params(
        k_params, state_size, action_size, reward_size, ensemble_size, hidden_size
    )
    padded, meta = prepare_padded_params(params, output_dim)

    x = jax.random.normal(
        k_x, (ensemble_size, N, state_size + action_size), dtype=jnp.float32
    )

    # --- collapsed-grid path (single step: all ensemble members at once) ---
    mean, var = ensemble_model_forward(
        x, padded, meta, reward_size=reward_size, mode="rs", ret_log_var=False
    )
    (mean, var) = jax.block_until_ready((mean, var))

    mean_bf, var_bf = _reference_forward(x, params, output_dim, bf16=True)
    mean_f32, var_f32 = _reference_forward(x, params, output_dim, bf16=False)

    assert mean.shape == (ensemble_size, N, output_dim)
    assert var.shape == (ensemble_size, N, output_dim)
    # tight check vs bf16-mirroring reference
    assert jnp.allclose(mean, mean_bf, atol=2e-3, rtol=2e-3)
    assert jnp.allclose(var, var_bf, atol=2e-3, rtol=2e-3)
    # loose check vs exact f32 module semantics (bf16 matmul tolerance)
    assert jnp.allclose(mean, mean_f32, atol=5e-2, rtol=5e-2)
    assert jnp.allclose(var, var_f32, atol=5e-2, rtol=5e-2)
    assert bool(jnp.all(jnp.isfinite(mean))) and bool(jnp.all(var > 0))

    # --- ret_log_var path (exp not fused) ---
    m2, lv2 = ensemble_model_forward(
        x, padded, meta, reward_size=reward_size, mode="rs", ret_log_var=True
    )
    (m2, lv2) = jax.block_until_ready((m2, lv2))
    assert jnp.allclose(jnp.exp(lv2), var, atol=1e-4, rtol=1e-4)
    assert jnp.allclose(m2, mean, atol=1e-6, rtol=1e-6)

    # --- tiled path: N > tile -> grid (E, N_tiles), weights resident over inner axis ---
    N2 = 600
    x2 = jax.random.normal(
        k_x2, (ensemble_size, N2, state_size + action_size), dtype=jnp.float32
    )
    mean2, var2 = ensemble_model_forward(
        x2, padded, meta, reward_size=reward_size, mode="rs", ret_log_var=False
    )
    (mean2, var2) = jax.block_until_ready((mean2, var2))
    mean2_bf, var2_bf = _reference_forward(x2, params, output_dim, bf16=True)
    assert mean2.shape == (ensemble_size, N2, output_dim)
    assert jnp.allclose(mean2, mean2_bf, atol=2e-3, rtol=2e-3)
    assert jnp.allclose(var2, var2_bf, atol=2e-3, rtol=2e-3)

    # TODO(synk): loss() / train() / get_decay_loss() are training-time utilities and are not
    # part of the forward pass; they are left to plain JAX/optax outside this kernel.
    print("KERNEL_OK")
</pallas_src>

<mosaic_0001>
module attributes {stable_mosaic.version = 11 : i64} {
  func.func @_ensemble_mlp_kernel(%arg0: i32, %arg1: i32, %arg2: memref<4x8x128xf32, #tpu.memory_space<vmem>>, %arg3: memref<4x128x128xbf16, #tpu.memory_space<vmem>>, %arg4: memref<4x1x128xf32, #tpu.memory_space<vmem>>, %arg5: memref<4x128x128xbf16, #tpu.memory_space<vmem>>, %arg6: memref<4x1x128xf32, #tpu.memory_space<vmem>>, %arg7: memref<4x128x128xbf16, #tpu.memory_space<vmem>>, %arg8: memref<4x1x128xf32, #tpu.memory_space<vmem>>, %arg9: memref<4x128x128xbf16, #tpu.memory_space<vmem>>, %arg10: memref<4x1x128xf32, #tpu.memory_space<vmem>>, %arg11: memref<4x128x128xbf16, #tpu.memory_space<vmem>>, %arg12: memref<4x1x128xf32, #tpu.memory_space<vmem>>, %arg13: memref<4x128x128xbf16, #tpu.memory_space<vmem>>, %arg14: memref<4x1x128xf32, #tpu.memory_space<vmem>>, %arg15: memref<1x128xf32, #tpu.memory_space<vmem>>, %arg16: memref<1x128xf32, #tpu.memory_space<vmem>>, %arg17: memref<4x8x128xf32, #tpu.memory_space<vmem>>, %arg18: memref<4x8x128xf32, #tpu.memory_space<vmem>>) attributes {dimension_semantics = [#tpu.dimension_semantics<parallel>, #tpu.dimension_semantics<parallel>], iteration_bounds = array<i64: 1, 1>, scalar_prefetch = 0 : i64, scratch_operands = 0 : i64, tpu.core_type = #tpu.core_type<tc>, window_params = [{transform_indices = @transform_0, window_bounds = array<i64: 4, 8, 128>}, {transform_indices = @transform_1, window_bounds = array<i64: 4, 128, 128>}, {transform_indices = @transform_2, window_bounds = array<i64: 4, 1, 128>}, {transform_indices = @transform_3, window_bounds = array<i64: 4, 128, 128>}, {transform_indices = @transform_4, window_bounds = array<i64: 4, 1, 128>}, {transform_indices = @transform_5, window_bounds = array<i64: 4, 128, 128>}, {transform_indices = @transform_6, window_bounds = array<i64: 4, 1, 128>}, {transform_indices = @transform_7, window_bounds = array<i64: 4, 128, 128>}, {transform_indices = @transform_8, window_bounds = array<i64: 4, 1, 128>}, {transform_indices = @transform_9, window_bounds = array<i64: 4, 128, 128>}, {transform_indices = @transform_10, window_bounds = array<i64: 4, 1, 128>}, {transform_indices = @transform_11, window_bounds = array<i64: 4, 128, 128>}, {transform_indices = @transform_12, window_bounds = array<i64: 4, 1, 128>}, {pipeline_mode = #tpu.pipeline_mode<synchronous>, transform_indices = @transform_13, window_bounds = array<i64: 1, 128>}, {pipeline_mode = #tpu.pipeline_mode<synchronous>, transform_indices = @transform_14, window_bounds = array<i64: 1, 128>}, {transform_indices = @transform_15, window_bounds = array<i64: 4, 8, 128>}, {transform_indices = @transform_16, window_bounds = array<i64: 4, 8, 128>}]} {
    %c0 = arith.constant 0 : index
    %c0_0 = arith.constant 0 : index
    %c0_1 = arith.constant 0 : index
    %0 = vector.load %arg2[%c0, %c0_0, %c0_1] : memref<4x8x128xf32, #tpu.memory_space<vmem>>, vector<4x8x128xf32>
    %1 = arith.truncf %0 : vector<4x8x128xf32> to vector<4x8x128xbf16>
    %c0_2 = arith.constant 0 : index
    %c0_3 = arith.constant 0 : index
    %c0_4 = arith.constant 0 : index
    %2 = vector.load %arg3[%c0_2, %c0_3, %c0_4] : memref<4x128x128xbf16, #tpu.memory_space<vmem>>, vector<4x128x128xbf16>
    "tpu.trace_start"() <{level = 10 : i32, message = "bnd,bdo->bno"}> : () -> ()
    %cst = arith.constant dense<0.000000e+00> : vector<4x8x128xf32>
    %3 = tpu.matmul %1, %2, %cst {dimension_numbers = #tpu.dot_dimension_numbers<[2], [1], [1], [2], [0, 0, 0, 1, 1, 2], [0], [0]>} : vector<4x8x128xbf16>, vector<4x128x128xbf16>, vector<4x8x128xf32> -> vector<4x8x128xf32>
    "tpu.trace_stop"() : () -> ()
    %c0_5 = arith.constant 0 : index
    %c0_6 = arith.constant 0 : index
    %c0_7 = arith.constant 0 : index
    %4 = vector.load %arg4[%c0_5, %c0_6, %c0_7] : memref<4x1x128xf32, #tpu.memory_space<vmem>>, vector<4x1x128xf32>
    %5 = vector.broadcast %4 : vector<4x1x128xf32> to vector<4x8x128xf32>
    %6 = arith.addf %3, %5 : vector<4x8x128xf32>
    %7 = arith.negf %6 : vector<4x8x128xf32>
    %8 = math.exp %7 : vector<4x8x128xf32>
    %cst_8 = arith.constant 1.000000e+00 : f32
    %9 = vector.broadcast %cst_8 : f32 to vector<4x8x128xf32>
    %10 = arith.addf %9, %8 : vector<4x8x128xf32>
    %11 = arith.divf %9, %10 : vector<4x8x128xf32>
    %12 = arith.mulf %6, %11 : vector<4x8x128xf32>
    %13 = arith.truncf %12 : vector<4x8x128xf32> to vector<4x8x128xbf16>
    %c0_9 = arith.constant 0 : index
    %c0_10 = arith.constant 0 : index
    %c0_11 = arith.constant 0 : index
    %14 = vector.load %arg5[%c0_9, %c0_10, %c0_11] : memref<4x128x128xbf16, #tpu.memory_space<vmem>>, vector<4x128x128xbf16>
    "tpu.trace_start"() <{level = 10 : i32, message = "bnd,bdo->bno"}> : () -> ()
    %cst_12 = arith.constant dense<0.000000e+00> : vector<4x8x128xf32>
    %15 = tpu.matmul %13, %14, %cst_12 {dimension_numbers = #tpu.dot_dimension_numbers<[2], [1], [1], [2], [0, 0, 0, 1, 1, 2], [0], [0]>} : vector<4x8x128xbf16>, vector<4x128x128xbf16>, vector<4x8x128xf32> -> vector<4x8x128xf32>
    "tpu.trace_stop"() : () -> ()
    %c0_13 = arith.constant 0 : index
    %c0_14 = arith.constant 0 : index
    %c0_15 = arith.constant 0 : index
    %16 = vector.load %arg6[%c0_13, %c0_14, %c0_15] : memref<4x1x128xf32, #tpu.memory_space<vmem>>, vector<4x1x128xf32>
    %17 = vector.broadcast %16 : vector<4x1x128xf32> to vector<4x8x128xf32>
    %18 = arith.addf %15, %17 : vector<4x8x128xf32>
    %19 = arith.negf %18 : vector<4x8x128xf32>
    %20 = math.exp %19 : vector<4x8x128xf32>
    %cst_16 = arith.constant 1.000000e+00 : f32
    %21 = vector.broadcast %cst_16 : f32 to vector<4x8x128xf32>
    %22 = arith.addf %21, %20 : vector<4x8x128xf32>
    %23 = arith.divf %21, %22 : vector<4x8x128xf32>
    %24 = arith.mulf %18, %23 : vector<4x8x128xf32>
    %25 = arith.truncf %24 : vector<4x8x128xf32> to vector<4x8x128xbf16>
    %c0_17 = arith.constant 0 : index
    %c0_18 = arith.constant 0 : index
    %c0_19 = arith.constant 0 : index
    %26 = vector.load %arg7[%c0_17, %c0_18, %c0_19] : memref<4x128x128xbf16, #tpu.memory_space<vmem>>, vector<4x128x128xbf16>
    "tpu.trace_start"() <{level = 10 : i32, message = "bnd,bdo->bno"}> : () -> ()
    %cst_20 = arith.constant dense<0.000000e+00> : vector<4x8x128xf32>
    %27 = tpu.matmul %25, %26, %cst_20 {dimension_numbers = #tpu.dot_dimension_numbers<[2], [1], [1], [2], [0, 0, 0, 1, 1, 2], [0], [0]>} : vector<4x8x128xbf16>, vector<4x128x128xbf16>, vector<4x8x128xf32> -> vector<4x8x128xf32>
    "tpu.trace_stop"() : () -> ()
    %c0_21 = arith.constant 0 : index
    %c0_22 = arith.constant 0 : index
    %c0_23 = arith.constant 0 : index
    %28 = vector.load %arg8[%c0_21, %c0_22, %c0_23] : memref<4x1x128xf32, #tpu.memory_space<vmem>>, vector<4x1x128xf32>
    %29 = vector.broadcast %28 : vector<4x1x128xf32> to vector<4x8x128xf32>
    %30 = arith.addf %27, %29 : vector<4x8x128xf32>
    %31 = arith.negf %30 : vector<4x8x128xf32>
    %32 = math.exp %31 : vector<4x8x128xf32>
    %cst_24 = arith.constant 1.000000e+00 : f32
    %33 = vector.broadcast %cst_24 : f32 to vector<4x8x128xf32>
    %34 = arith.addf %33, %32 : vector<4x8x128xf32>
    %35 = arith.divf %33, %34 : vector<4x8x128xf32>
    %36 = arith.mulf %30, %35 : vector<4x8x128xf32>
    %37 = arith.truncf %36 : vector<4x8x128xf32> to vector<4x8x128xbf16>
    %c0_25 = arith.constant 0 : index
    %c0_26 = arith.constant 0 : index
    %c0_27 = arith.constant 0 : index
    %38 = vector.load %arg9[%c0_25, %c0_26, %c0_27] : memref<4x128x128xbf16, #tpu.memory_space<vmem>>, vector<4x128x128xbf16>
    "tpu.trace_start"() <{level = 10 : i32, message = "bnd,bdo->bno"}> : () -> ()
    %cst_28 = arith.constant dense<0.000000e+00> : vector<4x8x128xf32>
    %39 = tpu.matmul %37, %38, %cst_28 {dimension_numbers = #tpu.dot_dimension_numbers<[2], [1], [1], [2], [0, 0, 0, 1, 1, 2], [0], [0]>} : vector<4x8x128xbf16>, vector<4x128x128xbf16>, vector<4x8x128xf32> -> vector<4x8x128xf32>
    "tpu.trace_stop"() : () -> ()
    %c0_29 = arith.constant 0 : index
    %c0_30 = arith.constant 0 : index
    %c0_31 = arith.constant 0 : index
    %40 = vector.load %arg10[%c0_29, %c0_30, %c0_31] : memref<4x1x128xf32, #tpu.memory_space<vmem>>, vector<4x1x128xf32>
    %41 = vector.broadcast %40 : vector<4x1x128xf32> to vector<4x8x128xf32>
    %42 = arith.addf %39, %41 : vector<4x8x128xf32>
    %43 = arith.negf %42 : vector<4x8x128xf32>
    %44 = math.exp %43 : vector<4x8x128xf32>
    %cst_32 = arith.constant 1.000000e+00 : f32
    %45 = vector.broadcast %cst_32 : f32 to vector<4x8x128xf32>
    %46 = arith.addf %45, %44 : vector<4x8x128xf32>
    %47 = arith.divf %45, %46 : vector<4x8x128xf32>
    %48 = arith.mulf %42, %47 : vector<4x8x128xf32>
    %49 = arith.truncf %48 : vector<4x8x128xf32> to vector<4x8x128xbf16>
    %c0_33 = arith.constant 0 : index
    %c0_34 = arith.constant 0 : index
    %c0_35 = arith.constant 0 : index
    %50 = vector.load %arg11[%c0_33, %c0_34, %c0_35] : memref<4x128x128xbf16, #tpu.memory_space<vmem>>, vector<4x128x128xbf16>
    "tpu.trace_start"() <{level = 10 : i32, message = "bnd,bdo->bno"}> : () -> ()
    %cst_36 = arith.constant dense<0.000000e+00> : vector<4x8x128xf32>
    %51 = tpu.matmul %49, %50, %cst_36 {dimension_numbers = #tpu.dot_dimension_numbers<[2], [1], [1], [2], [0, 0, 0, 1, 1, 2], [0], [0]>} : vector<4x8x128xbf16>, vector<4x128x128xbf16>, vector<4x8x128xf32> -> vector<4x8x128xf32>
    "tpu.trace_stop"() : () -> ()
    %c0_37 = arith.constant 0 : index
    %c0_38 = arith.constant 0 : index
    %c0_39 = arith.constant 0 : index
    %52 = vector.load %arg12[%c0_37, %c0_38, %c0_39] : memref<4x1x128xf32, #tpu.memory_space<vmem>>, vector<4x1x128xf32>
    %53 = vector.broadcast %52 : vector<4x1x128xf32> to vector<4x8x128xf32>
    %54 = arith.addf %51, %53 : vector<4x8x128xf32>
    %c0_40 = arith.constant 0 : index
    %c0_41 = arith.constant 0 : index
    %c0_42 = arith.constant 0 : index
    %55 = vector.load %arg13[%c0_40, %c0_41, %c0_42] : memref<4x128x128xbf16, #tpu.memory_space<vmem>>, vector<4x128x128xbf16>
    "tpu.trace_start"() <{level = 10 : i32, message = "bnd,bdo->bno"}> : () -> ()
    %cst_43 = arith.constant dense<0.000000e+00> : vector<4x8x128xf32>
    %56 = tpu.matmul %49, %55, %cst_43 {dimension_numbers = #tpu.dot_dimension_numbers<[2], [1], [1], [2], [0, 0, 0, 1, 1, 2], [0], [0]>} : vector<4x8x128xbf16>, vector<4x128x128xbf16>, vector<4x8x128xf32> -> vector<4x8x128xf32>
    "tpu.trace_stop"() : () -> ()
    %c0_44 = arith.constant 0 : index
    %c0_45 = arith.constant 0 : index
    %c0_46 = arith.constant 0 : index
    %57 = vector.load %arg14[%c0_44, %c0_45, %c0_46] : memref<4x1x128xf32, #tpu.memory_space<vmem>>, vector<4x1x128xf32>
    %58 = vector.broadcast %57 : vector<4x1x128xf32> to vector<4x8x128xf32>
    %59 = arith.addf %56, %58 : vector<4x8x128xf32>
    %c0_47 = arith.constant 0 : index
    %c0_48 = arith.constant 0 : index
    %60 = vector.load %arg15[%c0_47, %c0_48] : memref<1x128xf32, #tpu.memory_space<vmem>>, vector<1x128xf32>
    %c0_49 = arith.constant 0 : index
    %c0_50 = arith.constant 0 : index
    %61 = vector.load %arg16[%c0_49, %c0_50] : memref<1x128xf32, #tpu.memory_space<vmem>>, vector<1x128xf32>
    %62 = vector.shape_cast %60 : vector<1x128xf32> to vector<1x1x128xf32>
    %63 = vector.broadcast %62 : vector<1x1x128xf32> to vector<4x8x128xf32>
    %64 = arith.subf %63, %59 : vector<4x8x128xf32>
    %cst_51 = arith.constant 0.000000e+00 : f32
    %65 = vector.broadcast %cst_51 : f32 to vector<4x8x128xf32>
    %66 = arith.maximumf %64, %65 : vector<4x8x128xf32>
    %67 = vector.broadcast %cst_51 : f32 to vector<4x8x128xf32>
    %68 = arith.subf %64, %67 : vector<4x8x128xf32>
    %69 = arith.cmpf one, %68, %68 : vector<4x8x128xf32>
    %70 = vector.broadcast %cst_51 : f32 to vector<4x8x128xf32>
    %71 = arith.addf %64, %70 : vector<4x8x128xf32>
    %72 = math.absf %68 : vector<4x8x128xf32>
    %cst_52 = arith.constant 0.000000e+00 : f32
    %73 = vector.broadcast %cst_52 : f32 to vector<4x8x128xf32>
    %74 = arith.subf %73, %72 : vector<4x8x128xf32>
    %75 = math.exp %74 : vector<4x8x128xf32>
    %76 = math.log1p %75 : vector<4x8x128xf32>
    %77 = arith.addf %66, %76 : vector<4x8x128xf32>
    %78 = arith.select %69, %71, %77 : vector<4x8x128xi1>, vector<4x8x128xf32>
    %79 = vector.shape_cast %60 : vector<1x128xf32> to vector<1x1x128xf32>
    %80 = vector.broadcast %79 : vector<1x1x128xf32> to vector<4x8x128xf32>
    %81 = arith.subf %80, %78 : vector<4x8x128xf32>
    %82 = vector.shape_cast %61 : vector<1x128xf32> to vector<1x1x128xf32>
    %83 = vector.broadcast %82 : vector<1x1x128xf32> to vector<4x8x128xf32>
    %84 = arith.subf %81, %83 : vector<4x8x128xf32>
    %cst_53 = arith.constant 0.000000e+00 : f32
    %85 = vector.broadcast %cst_53 : f32 to vector<4x8x128xf32>
    %86 = arith.maximumf %84, %85 : vector<4x8x128xf32>
    %87 = vector.broadcast %cst_53 : f32 to vector<4x8x128xf32>
    %88 = arith.subf %84, %87 : vector<4x8x128xf32>
    %89 = arith.cmpf one, %88, %88 : vector<4x8x128xf32>
    %90 = vector.broadcast %cst_53 : f32 to vector<4x8x128xf32>
    %91 = arith.addf %84, %90 : vector<4x8x128xf32>
    %92 = math.absf %88 : vector<4x8x128xf32>
    %cst_54 = arith.constant 0.000000e+00 : f32
    %93 = vector.broadcast %cst_54 : f32 to vector<4x8x128xf32>
    %94 = arith.subf %93, %92 : vector<4x8x128xf32>
    %95 = math.exp %94 : vector<4x8x128xf32>
    %96 = math.log1p %95 : vector<4x8x128xf32>
    %97 = arith.addf %86, %96 : vector<4x8x128xf32>
    %98 = arith.select %89, %91, %97 : vector<4x8x128xi1>, vector<4x8x128xf32>
    %99 = vector.shape_cast %61 : vector<1x128xf32> to vector<1x1x128xf32>
    %100 = vector.broadcast %99 : vector<1x1x128xf32> to vector<4x8x128xf32>
    %101 = arith.addf %100, %98 : vector<4x8x128xf32>
    %c0_55 = arith.constant 0 : index
    %c0_56 = arith.constant 0 : index
    %c0_57 = arith.constant 0 : index
    %102 = vector.load %arg17[%c0_55, %c0_56, %c0_57] : memref<4x8x128xf32, #tpu.memory_space<vmem>>, vector<4x8x128xf32>
    tpu.vector_store %arg17[%c0_55, %c0_56, %c0_57], %54 {strides = array<i32>} : memref<4x8x128xf32, #tpu.memory_space<vmem>>, vector<4x8x128xf32>,
    %103 = math.exp %101 : vector<4x8x128xf32>
    %c0_58 = arith.constant 0 : index
    %c0_59 = arith.constant 0 : index
    %c0_60 = arith.constant 0 : index
    %104 = vector.load %arg18[%c0_58, %c0_59, %c0_60] : memref<4x8x128xf32, #tpu.memory_space<vmem>>, vector<4x8x128xf32>
    tpu.vector_store %arg18[%c0_58, %c0_59, %c0_60], %103 {strides = array<i32>} : memref<4x8x128xf32, #tpu.memory_space<vmem>>, vector<4x8x128xf32>,
    return
  }
  func.func @transform_0(%arg0: i32, %arg1: i32) -> (i32, i32, i32) {
    %c0_i32 = arith.constant 0 : i32
    %c0_i32_0 = arith.constant 0 : i32
    return %arg0, %arg1, %c0_i32 : i32, i32, i32
  }
  func.func @transform_1(%arg0: i32, %arg1: i32) -> (i32, i32, i32) {
    %c0_i32 = arith.constant 0 : i32
    %c0_i32_0 = arith.constant 0 : i32
    %c0_i32_1 = arith.constant 0 : i32
    return %arg0, %c0_i32, %c0_i32_0 : i32, i32, i32
  }
  func.func @transform_2(%arg0: i32, %arg1: i32) -> (i32, i32, i32) {
    %c0_i32 = arith.constant 0 : i32
    %c0_i32_0 = arith.constant 0 : i32
    %c0_i32_1 = arith.constant 0 : i32
    return %arg0, %c0_i32, %c0_i32_0 : i32, i32, i32
  }
  func.func @transform_3(%arg0: i32, %arg1: i32) -> (i32, i32, i32) {
    %c0_i32 = arith.constant 0 : i32
    %c0_i32_0 = arith.constant 0 : i32
    %c0_i32_1 = arith.constant 0 : i32
    return %arg0, %c0_i32, %c0_i32_0 : i32, i32, i32
  }
  func.func @transform_4(%arg0: i32, %arg1: i32) -> (i32, i32, i32) {
    %c0_i32 = arith.constant 0 : i32
    %c0_i32_0 = arith.constant 0 : i32
    %c0_i32_1 = arith.constant 0 : i32
    return %arg0, %c0_i32, %c0_i32_0 : i32, i32, i32
  }
  func.func @transform_5(%arg0: i32, %arg1: i32) -> (i32, i32, i32) {
    %c0_i32 = arith.constant 0 : i32
    %c0_i32_0 = arith.constant 0 : i32
    %c0_i32_1 = arith.constant 0 : i32
    return %arg0, %c0_i32, %c0_i32_0 : i32, i32, i32
  }
  func.func @transform_6(%arg0: i32, %arg1: i32) -> (i32, i32, i32) {
    %c0_i32 = arith.constant 0 : i32
    %c0_i32_0 = arith.constant 0 : i32
    %c0_i32_1 = arith.constant 0 : i32
    return %arg0, %c0_i32, %c0_i32_0 : i32, i32, i32
  }
  func.func @transform_7(%arg0: i32, %arg1: i32) -> (i32, i32, i32) {
    %c0_i32 = arith.constant 0 : i32
    %c0_i32_0 = arith.constant 0 : i32
    %c0_i32_1 = arith.constant 0 : i32
    return %arg0, %c0_i32, %c0_i32_0 : i32, i32, i32
  }
  func.func @transform_8(%arg0: i32, %arg1: i32) -> (i32, i32, i32) {
    %c0_i32 = arith.constant 0 : i32
    %c0_i32_0 = arith.constant 0 : i32
    %c0_i32_1 = arith.constant 0 : i32
    return %arg0, %c0_i32, %c0_i32_0 : i32, i32, i32
  }
  func.func @transform_9(%arg0: i32, %arg1: i32) -> (i32, i32, i32) {
    %c0_i32 = arith.constant 0 : i32
    %c0_i32_0 = arith.constant 0 : i32
    %c0_i32_1 = arith.constant 0 : i32
    return %arg0, %c0_i32, %c0_i32_0 : i32, i32, i32
  }
  func.func @transform_10(%arg0: i32, %arg1: i32) -> (i32, i32, i32) {
    %c0_i32 = arith.constant 0 : i32
    %c0_i32_0 = arith.constant 0 : i32
    %c0_i32_1 = arith.constant 0 : i32
    return %arg0, %c0_i32, %c0_i32_0 : i32, i32, i32
  }
  func.func @transform_11(%arg0: i32, %arg1: i32) -> (i32, i32, i32) {
    %c0_i32 = arith.constant 0 : i32
    %c0_i32_0 = arith.constant 0 : i32
    %c0_i32_1 = arith.constant 0 : i32
    return %arg0, %c0_i32, %c0_i32_0 : i32, i32, i32
  }
  func.func @transform_12(%arg0: i32, %arg1: i32) -> (i32, i32, i32) {
    %c0_i32 = arith.constant 0 : i32
    %c0_i32_0 = arith.constant 0 : i32
    %c0_i32_1 = arith.constant 0 : i32
    return %arg0, %c0_i32, %c0_i32_0 : i32, i32, i32
  }
  func.func @transform_13(%arg0: i32, %arg1: i32) -> (i32, i32) {
    %c0_i32 = arith.constant 0 : i32
    %c0_i32_0 = arith.constant 0 : i32
    %c0_i32_1 = arith.constant 0 : i32
    return %c0_i32, %c0_i32_0 : i32, i32
  }
  func.func @transform_14(%arg0: i32, %arg1: i32) -> (i32, i32) {
    %c0_i32 = arith.constant 0 : i32
    %c0_i32_0 = arith.constant 0 : i32
    %c0_i32_1 = arith.constant 0 : i32
    return %c0_i32, %c0_i32_0 : i32, i32
  }
  func.func @transform_15(%arg0: i32, %arg1: i32) -> (i32, i32, i32) {
    %c0_i32 = arith.constant 0 : i32
    %c0_i32_0 = arith.constant 0 : i32
    return %arg0, %arg1, %c0_i32 : i32, i32, i32
  }
  func.func @transform_16(%arg0: i32, %arg1: i32) -> (i32, i32, i32) {
    %c0_i32 = arith.constant 0 : i32
    %c0_i32_0 = arith.constant 0 : i32
    return %arg0, %arg1, %c0_i32 : i32, i32, i32
  }
}

</mosaic_0001>

<bundles_post_ra>
// kernel: tpu_custom_call.1
= control target key start
LH: loop header
LB: loop body
LE: loop exit
PB: predicated region body
PF: predicated region fallthrough
CT: control target
= control target key end

     0   :  { %s5283_s0 = inlined_call_operand.hbm [shape: f32[4,8,128], index: 0, kind: input, shape index: {}]   ;;  %s5284_s1 = inlined_call_operand.hbm [shape: bf16[4,128,128], index: 1, kind: input, shape index: {}]   ;;  %s5285_s2 = inlined_call_operand.vmem [shape: f32[4,1,128], index: 2, kind: input, shape index: {}]   ;;  %s5286_s3 = inlined_call_operand.hbm [shape: bf16[4,128,128], index: 3, kind: input, shape index: {}]   ;;  %s5287_s4 = inlined_call_operand.vmem [shape: f32[4,1,128], index: 4, kind: input, shape index: {}]   ;;  %s5288_s5 = inlined_call_operand.hbm [shape: bf16[4,128,128], index: 5, kind: input, shape index: {}]   ;;  %s5289_s6 = inlined_call_operand.vmem [shape: f32[4,1,128], index: 6, kind: input, shape index: {}]   ;;  %s5290_s7 = inlined_call_operand.hbm [shape: bf16[4,128,128], index: 7, kind: input, shape index: {}]   ;;  %s5291_s8 = inlined_call_operand.vmem [shape: f32[4,1,128], index: 8, kind: input, shape index: {}]   ;;  %s5292_s9 = inlined_call_operand.hbm [shape: bf16[4,128,128], index: 9, kind: input, shape index: {}]   ;;  %s5293_s10 = inlined_call_operand.vmem [shape: f32[4,1,128], index: 10, kind: input, shape index: {}]   ;;  %s5294_s11 = inlined_call_operand.hbm [shape: bf16[4,128,128], index: 11, kind: input, shape index: {}]   ;;  %s5295_s12 = inlined_call_operand.vmem [shape: f32[4,1,128], index: 12, kind: input, shape index: {}]   ;;  %s5296_s13 = inlined_call_operand.vmem [shape: f32[1,128], index: 13, kind: input, shape index: {}]   ;;  %s5297_s14 = inlined_call_operand.vmem [shape: f32[1,128], index: 14, kind: input, shape index: {}]   ;;  %s5298_s15 = inlined_call_operand.hbm [shape: f32[4,8,128], index: 15, kind: output, shape index: {0}]   ;;  %s5299_s16 = inlined_call_operand.hbm [shape: f32[4,8,128], index: 16, kind: output, shape index: {1}]  }
   0x1   :  { %5302 = sst [smem:[#allocation23_spill]] %s5283_s0 }
   0x2   :  { %5303 = sst [smem:[#allocation24_spill]] %s5299_s16 }
   0x3   :  { %22 = vsyncpa [#allocation3], 0 }
   0x4   :  { %23 = vsyncpa [#allocation6], 0 }
   0x5   :  { %24 = vsyncpa [#allocation9], 0 }
   0x6   :  { %25 = vsyncpa [#allocation12], 0 }
   0x7   :  { %26 = vsyncpa [#allocation4], 0 }
   0x8   :  { %27 = vsyncpa [#allocation16], 0  ;;  %s4627_s21 = smov [#allocation5]   ;;  %s4417_s25 = scalar_lea.hbm %s5284_s1, 4096 }
   0x9   :  { %s45_s22 = sshll.u32 %s4627_s21, 4  ;;  %p4418_p0 = scmp.ne.s32.totalorder %s5284_s1, %s4417_s25  ;;  %s46_s22 = int_to_ptr.vmem [resolvable:$true] %s45_s22 }
   0xa   :  { %p4421_p1 = scmp.lt.u32.totalorder %s4417_s25, %s5284_s1 }
   0xc   :  { %p4423_p2 = pnand %p4421_p1, %p4418_p0 }
   0xe   :  { %4426 = shalt.err (!%p4423_p2)
}
   0xf   :  { %s4427_s30 = scalar_lea.vmem %s46_s22, 4096  ;;  %p4432_p4 = scmp.lt.s32.totalorder %s46_s22, %s46_s22 }
  0x10   :  { %p4428_p3 = scmp.ne.s32.totalorder %s46_s22, %s4427_s30  ;;  %p4433_p5 = scmp.lt.s32.totalorder %s4427_s30, %s4427_s30 }
  0x12   :  { %p4434_p6 = por %p4433_p5, %p4432_p4 }
  0x14   :  { %p4435_p7 = pnand %p4434_p6, %p4428_p3 }
  0x16   :  { %4438 = shalt.err (!%p4435_p7)
}
  0x17   :  { %s4628_s0 = smov 64   ;;  %s4629_s17 = smov 4  }
  0x18   :  { %51 = dma.hbm_to_vmem [thread:$0]  %s5284_s1, 4096, %s46_s22, [#allocation6], %s4628_s0, %s4628_s0, %s4629_s17  }
  0x19   :  { %s4630_s20 = smov [#allocation8]   ;;  %s4631_s23 = smov [#allocation11]  }
  0x1a   :  { %s73_s21 = sshll.u32 %s4630_s20, 4  ;;  %s101_s24 = sshll.u32 %s4631_s23, 4  ;;  %s74_s21 = int_to_ptr.vmem [resolvable:$true] %s73_s21  ;;  %s102_s24 = int_to_ptr.vmem [resolvable:$true] %s101_s24 }
  0x1b   :  { %s4439_s27 = scalar_lea.hbm %s5288_s5, 4096 }
  0x1c   :  { %p4440_p8 = scmp.ne.s32.totalorder %s5288_s5, %s4439_s27  ;;  %p4443_p9 = scmp.lt.u32.totalorder %s4439_s27, %s5288_s5 }
  0x1e   :  { %p4445_p10 = pnand %p4443_p9, %p4440_p8 }
  0x20   :  { %4448 = shalt.err (!%p4445_p10)
}
  0x21   :  { %s4449_s1 = scalar_lea.vmem %s74_s21, 4096  ;;  %p4454_p12 = scmp.lt.s32.totalorder %s74_s21, %s74_s21 }
  0x22   :  { %p4450_p11 = scmp.ne.s32.totalorder %s74_s21, %s4449_s1  ;;  %p4455_p13 = scmp.lt.s32.totalorder %s4449_s1, %s4449_s1 }
  0x24   :  { %p4456_p0 = por %p4455_p13, %p4454_p12 }
  0x26   :  { %p4457_p1 = pnand %p4456_p0, %p4450_p11 }
  0x28   :  { %4460 = shalt.err (!%p4457_p1)
}
  0x29   :  { %79 = dma.hbm_to_vmem [thread:$0]  %s5288_s5, 4096, %s74_s21, [#allocation9], %s4628_s0, %s4628_s0, %s4629_s17  }
  0x2a   :  { %s4461_s20 = scalar_lea.hbm %s5292_s9, 4096 }
  0x2b   :  { %p4462_p2 = scmp.ne.s32.totalorder %s5292_s9, %s4461_s20  ;;  %p4465_p3 = scmp.lt.u32.totalorder %s4461_s20, %s5292_s9 }
  0x2d   :  { %p4467_p4 = pnand %p4465_p3, %p4462_p2 }
  0x2f   :  { %4470 = shalt.err (!%p4467_p4)
}
  0x30   :  { %s4471_s28 = scalar_lea.vmem %s102_s24, 4096  ;;  %p4476_p6 = scmp.lt.s32.totalorder %s102_s24, %s102_s24 }
  0x31   :  { %p4472_p5 = scmp.ne.s32.totalorder %s102_s24, %s4471_s28  ;;  %p4477_p7 = scmp.lt.s32.totalorder %s4471_s28, %s4471_s28 }
  0x33   :  { %p4478_p8 = por %p4477_p7, %p4476_p6 }
  0x35   :  { %p4479_p9 = pnand %p4478_p8, %p4472_p5 }
  0x37   :  { %4482 = shalt.err (!%p4479_p9)
}
  0x38   :  { %107 = dma.hbm_to_vmem [thread:$0]  %s5292_s9, 4096, %s102_s24, [#allocation12], %s4628_s0, %s4628_s0, %s4629_s17  }
  0x39   :  { %s4632_s29 = smov [#allocation2]   ;;  %s5304_s18 = sld [smem:[#allocation23_spill]] }
  0x3a   :  { %s33_s30 = sshll.u32 %s4632_s29, 4  ;;  %s34_s30 = int_to_ptr.vmem [resolvable:$true] %s33_s30 }
  0x3f   :  { %s4483_s19 = scalar_lea.hbm %s5304_s18, 512 }
  0x40   :  { %p4484_p10 = scmp.ne.s32.totalorder %s5304_s18, %s4483_s19  ;;  %p4487_p11 = scmp.lt.u32.totalorder %s4483_s19, %s5304_s18 }
  0x42   :  { %p4489_p12 = pnand %p4487_p11, %p4484_p10 }
  0x44   :  { %4492 = shalt.err (!%p4489_p12)
}
  0x45   :  { %s4493_s26 = scalar_lea.vmem %s34_s30, 512  ;;  %p4498_p0 = scmp.lt.s32.totalorder %s34_s30, %s34_s30 }
  0x46   :  { %p4494_p13 = scmp.ne.s32.totalorder %s34_s30, %s4493_s26  ;;  %p4499_p1 = scmp.lt.s32.totalorder %s4493_s26, %s4493_s26 }
  0x48   :  { %p4500_p2 = por %p4499_p1, %p4498_p0 }
  0x4a   :  { %p4501_p3 = pnand %p4500_p2, %p4494_p13 }
  0x4c   :  { %4504 = shalt.err (!%p4501_p3)
}
  0x4d   :  { %s4633_s9 = smov 128   ;;  %s4634_s24 = smov 8  }
  0x4e   :  { %39 = dma.hbm_to_vmem [thread:$0]  %s5304_s18, 512, %s34_s30, [#allocation3], %s4633_s9, %s4633_s9, %s4634_s24  }
  0x4f   :  { %s4635_s5 = smov [#allocation7]   ;;  %s4636_s29 = smov [#allocation10]  }
  0x50   :  { %s59_s21 = sshll.u32 %s4635_s5, 4  ;;  %s87_s1 = sshll.u32 %s4636_s29, 4  ;;  %s60_s21 = int_to_ptr.vmem [resolvable:$true] %s59_s21  ;;  %s4787_s1 = int_to_ptr.vmem [resolvable:$true] %s87_s1 }
  0x51   :  { %s4505_s16 = scalar_lea.hbm %s5286_s3, 4096 }
  0x52   :  { %p4506_p4 = scmp.ne.s32.totalorder %s5286_s3, %s4505_s16  ;;  %p4509_p5 = scmp.lt.u32.totalorder %s4505_s16, %s5286_s3 }
  0x54   :  { %p4511_p6 = pnand %p4509_p5, %p4506_p4 }
  0x56   :  { %4514 = shalt.err (!%p4511_p6)
}
  0x57   :  { %s4515_s30 = scalar_lea.vmem %s60_s21, 4096  ;;  %p4520_p8 = scmp.lt.s32.totalorder %s60_s21, %s60_s21 }
  0x58   :  { %p4516_p7 = scmp.ne.s32.totalorder %s60_s21, %s4515_s30  ;;  %p4521_p9 = scmp.lt.s32.totalorder %s4515_s30, %s4515_s30 }
  0x5a   :  { %p4522_p10 = por %p4521_p9, %p4520_p8 }
  0x5c   :  { %p4523_p11 = pnand %p4522_p10, %p4516_p7 }
  0x5e   :  { %4526 = shalt.err (!%p4523_p11)
}
  0x5f   :  { %65 = dma.hbm_to_vmem [thread:$0]  %s5286_s3, 4096, %s60_s21, [#allocation6], %s4628_s0, %s4628_s0, %s4629_s17  }
  0x60   :  { %s4527_s29 = scalar_lea.hbm %s5290_s7, 4096 }
  0x61   :  { %p4528_p12 = scmp.ne.s32.totalorder %s5290_s7, %s4527_s29  ;;  %p4531_p13 = scmp.lt.u32.totalorder %s4527_s29, %s5290_s7 }
  0x63   :  { %p4533_p0 = pnand %p4531_p13, %p4528_p12 }
  0x65   :  { %4536 = shalt.err (!%p4533_p0)
}
  0x66   :  { %s4537_s23 = scalar_lea.vmem %s4787_s1, 4096  ;;  %p4542_p2 = scmp.lt.s32.totalorder %s4787_s1, %s4787_s1 }
  0x67   :  { %p4538_p1 = scmp.ne.s32.totalorder %s4787_s1, %s4537_s23  ;;  %p4543_p3 = scmp.lt.s32.totalorder %s4537_s23, %s4537_s23 }
  0x69   :  { %p4544_p4 = por %p4543_p3, %p4542_p2 }
  0x6b   :  { %p4545_p5 = pnand %p4544_p4, %p4538_p1 }
  0x6d   :  { %4548 = shalt.err (!%p4545_p5)
}
  0x6e   :  { %93 = dma.hbm_to_vmem [thread:$0]  %s5290_s7, 4096, %s4787_s1, [#allocation9], %s4628_s0, %s4628_s0, %s4629_s17  }
  0x6f   :  { %s4637_s25 = smov [#allocation13]   ;;  %s4549_s27 = scalar_lea.hbm %s5294_s11, 4096 }
  0x70   :  { %s115_s26 = sshll.u32 %s4637_s25, 4  ;;  %p4550_p6 = scmp.ne.s32.totalorder %s5294_s11, %s4549_s27  ;;  %s116_s26 = int_to_ptr.vmem [resolvable:$true] %s115_s26 }
  0x71   :  { %p4553_p7 = scmp.lt.u32.totalorder %s4549_s27, %s5294_s11 }
  0x73   :  { %p4555_p8 = pnand %p4553_p7, %p4550_p6 }
  0x75   :  { %4558 = shalt.err (!%p4555_p8)
}
  0x76   :  { %s4559_s19 = scalar_lea.vmem %s116_s26, 4096  ;;  %p4564_p10 = scmp.lt.s32.totalorder %s116_s26, %s116_s26 }
  0x77   :  { %p4560_p9 = scmp.ne.s32.totalorder %s116_s26, %s4559_s19  ;;  %p4565_p11 = scmp.lt.s32.totalorder %s4559_s19, %s4559_s19 }
  0x79   :  { %p4566_p12 = por %p4565_p11, %p4564_p10 }
  0x7b   :  { %p4567_p13 = pnand %p4566_p12, %p4560_p9 }
  0x7d   :  { %4570 = shalt.err (!%p4567_p13)
}
  0x7e   :  { %121 = dma.hbm_to_vmem [thread:$0]  %s5294_s11, 4096, %s116_s26, [#allocation12], %s4628_s0, %s4628_s0, %s4629_s17  }
  0x7f   :  { %4615 = dma.done.wait [#allocation3], 512  }
  0x80   :  { %4616 = vsyncadd [#allocation3], 4294966784 }
  0x81   :  { %4617 = dma.done.wait [#allocation6], 8192  }
  0x82   :  { %4618 = vsyncadd [#allocation6], 4294959104 }
  0x83   :  { %4619 = dma.done.wait [#allocation9], 8192  }
  0x84   :  { %4620 = vsyncadd [#allocation9], 4294959104 }
  0x85   :  { %4621 = dma.done.wait [#allocation12], 8192  }
  0x86   :  { %4622 = vsyncadd [#allocation12], 4294959104  ;;  %v4638_v0 = vmov 0.0   ;;  %vm4639_vm0 = vmmov 0   ;;  %v4121_v1 = vld [vmem:[#allocation5] sm:$0xff]   ;;  %v4123_v3 = vld [vmem:[#allocation5 + $0x8] sm:$0xff]  }
  0x87   :  { %3626 = vmatprep.subr.bf16.mxu0 %v4638_v0  ;;  %3646 = vmatprep.subr.bf16.mxu1 %v4638_v0  ;;  %v4122_v2 = vld [vmem:[#allocation5 + $0x40] sm:$0xff]   ;;  %v4124_v4 = vld [vmem:[#allocation5 + $0x48] sm:$0xff]   ;;  %v4125_v5 = vld [vmem:[#allocation5 + $0x10] sm:$0xff]  }
  0x88   :  { %3642 = vmatprep.mubr.msk.bf16.mxu0 %vm4639_vm0, %v4638_v0  ;;  %3662 = vmatprep.mubr.msk.bf16.mxu1 %vm4639_vm0, %v4638_v0  ;;  %v4126_v6 = vld [vmem:[#allocation5 + $0x50] sm:$0xff]   ;;  %v4127_v7 = vld [vmem:[#allocation5 + $0x18] sm:$0xff]   ;;  %v4129_v9 = vld [vmem:[#allocation5 + $0x20] sm:$0xff]  }
  0x89   :  { %3627 = vmatpush3.bf16.msra.mxu0 %v4121_v1  ;;  %3647 = vmatpush3.bf16.msra.mxu1 %v4122_v2  ;;  %v4128_v8 = vld [vmem:[#allocation5 + $0x58] sm:$0xff]   ;;  %v4130_v10 = vld [vmem:[#allocation5 + $0x60] sm:$0xff]   ;;  %v4131_v11 = vld [vmem:[#allocation5 + $0x28] sm:$0xff]  }
  0x8a   :  { %3628 = vmatprep.subr.bf16.mxu0 %v4638_v0  ;;  %3648 = vmatprep.subr.bf16.mxu1 %v4638_v0  ;;  %v4132_v12 = vld [vmem:[#allocation5 + $0x68] sm:$0xff]   ;;  %v4133_v13 = vld [vmem:[#allocation5 + $0x30] sm:$0xff]   ;;  %v4135_v15 = vld [vmem:[#allocation5 + $0x38] sm:$0xff]  }
  0x8b   :  { %v4134_v14 = vld [vmem:[#allocation5 + $0x70] sm:$0xff]   ;;  %v4136_v16 = vld [vmem:[#allocation5 + $0x78] sm:$0xff]   ;;  %v150_v17 = vld [vmem:[#allocation2] sm:$0xff] }
  0x8c   :  { %v151_v18 = vld [vmem:[#allocation2 + $0x8] sm:$0xff]  ;;  %v154_v19 = vpack.c.bf16 %v150_v17, %v150_v17  ;;  %v4137_v21 = vld [vmem:[#allocation5 + $0x80] sm:$0xff]   ;;  %v4141_v25 = vld [vmem:[#allocation5 + $0x90] sm:$0xff]  }
  0x8d   :  { %3629 = vmatpush3.bf16.msra.mxu0 %v4123_v3  ;;  %3649 = vmatpush3.bf16.msra.mxu1 %v4124_v4  ;;  %v155_v20 = vpack.c.bf16 %v151_v18, %v151_v18  ;;  %v4138_v22 = vld [vmem:[#allocation5 + $0xc0] sm:$0xff]   ;;  %v4139_v23 = vld [vmem:[#allocation5 + $0x88] sm:$0xff]   ;;  %v4142_v26 = vld [vmem:[#allocation5 + $0xd0] sm:$0xff]  }
  0x8e   :  { %3630 = vmatprep.subr.bf16.mxu0 %v4638_v0  ;;  %3650 = vmatprep.subr.bf16.mxu1 %v4638_v0  ;;  %v4140_v24 = vld [vmem:[#allocation5 + $0xc8] sm:$0xff]   ;;  %v4143_v27 = vld [vmem:[#allocation5 + $0x98] sm:$0xff]   ;;  %v4145_v29 = vld [vmem:[#allocation5 + $0xa0] sm:$0xff]  }
  0x8f   :  { %v4144_v28 = vld [vmem:[#allocation5 + $0xd8] sm:$0xff]   ;;  %v4146_v30 = vld [vmem:[#allocation5 + $0xe0] sm:$0xff]   ;;  %v4147_v31 = vld [vmem:[#allocation5 + $0xa8] sm:$0xff]  }
  0x90   :  { %v4148_v32 = vld [vmem:[#allocation5 + $0xe8] sm:$0xff]   ;;  %v4149_v33 = vld [vmem:[#allocation5 + $0xb0] sm:$0xff]   ;;  %v4151_v35 = vld [vmem:[#allocation5 + $0xb8] sm:$0xff]  }
  0x91   :  { %3631 = vmatpush3.bf16.msra.mxu0 %v4125_v5  ;;  %3651 = vmatpush3.bf16.msra.mxu1 %v4126_v6  ;;  %v4150_v34 = vld [vmem:[#allocation5 + $0xf0] sm:$0xff]   ;;  %v4152_v37 = vld [vmem:[#allocation5 + $0xf8] sm:$0xff]   ;;  %v4153_v41 = vld [vmem:[#allocation7] sm:$0xff]  }
  0x92   :  { %3632 = vmatprep.subr.bf16.mxu0 %v4638_v0  ;;  %3652 = vmatprep.subr.bf16.mxu1 %v4638_v0  ;;  %v152_v36 = vld [vmem:[#allocation2 + $0x10] sm:$0xff]  ;;  %v153_v38 = vld [vmem:[#allocation2 + $0x18] sm:$0xff]  ;;  %v4154_v42 = vld [vmem:[#allocation7 + $0x40] sm:$0xff]  }
  0x93   :  { %v156_v39 = vpack.c.bf16 %v152_v36, %v152_v36  ;;  %v157_v40 = vpack.c.bf16 %v153_v38, %v153_v38  ;;  %v4155_v43 = vld [vmem:[#allocation7 + $0x8] sm:$0xff]   ;;  %v4157_v45 = vld [vmem:[#allocation7 + $0x10] sm:$0xff]   ;;  %v4159_v47 = vld [vmem:[#allocation7 + $0x18] sm:$0xff]  }
  0x94   :  { %v4156_v44 = vld [vmem:[#allocation7 + $0x48] sm:$0xff]   ;;  %v4158_v46 = vld [vmem:[#allocation7 + $0x50] sm:$0xff]   ;;  %v4160_v48 = vld [vmem:[#allocation7 + $0x58] sm:$0xff]  }
  0x95   :  { %3633 = vmatpush3.bf16.msra.mxu0 %v4127_v7  ;;  %3653 = vmatpush3.bf16.msra.mxu1 %v4128_v8  ;;  %v4161_v49 = vld [vmem:[#allocation7 + $0x20] sm:$0xff]   ;;  %v4163_v51 = vld [vmem:[#allocation7 + $0x28] sm:$0xff]   ;;  %v4165_v53 = vld [vmem:[#allocation7 + $0x30] sm:$0xff]  }
  0x96   :  { %3634 = vmatprep.subr.bf16.mxu0 %v4638_v0  ;;  %3654 = vmatprep.subr.bf16.mxu1 %v4638_v0  ;;  %v4162_v50 = vld [vmem:[#allocation7 + $0x60] sm:$0xff]   ;;  %v4164_v52 = vld [vmem:[#allocation7 + $0x68] sm:$0xff]   ;;  %v4166_v54 = vld [vmem:[#allocation7 + $0x70] sm:$0xff]  }
  0x97   :  { %v4167_v55 = vld [vmem:[#allocation7 + $0x38] sm:$0xff]   ;;  %v3176_v57 = vld [vmem:[%s5285_s2] ss:$0 sm:$0xff]  ;;  %v3177_v58 = vld [vmem:[%s5285_s2 + $0x1] ss:$0 sm:$0xff] }
  0x98   :  { %v4168_v56 = vld [vmem:[#allocation7 + $0x78] sm:$0xff]   ;;  %v4169_v17 = vld [vmem:[#allocation7 + $0x80] sm:$0xff]   ;;  %v4173_v36 = vld [vmem:[#allocation7 + $0x90] sm:$0xff]  }
  0x99   :  { %3635 = vmatpush3.bf16.msra.mxu0 %v4129_v9  ;;  %3655 = vmatpush3.bf16.msra.mxu1 %v4130_v10  ;;  %v4175_v38 = vld [vmem:[#allocation7 + $0x98] sm:$0xff]  }
  0x9a   :  { %3636 = vmatprep.subr.bf16.mxu0 %v4638_v0  ;;  %3656 = vmatprep.subr.bf16.mxu1 %v4638_v0 }
  0x9d   :  { %3637 = vmatpush3.bf16.msra.mxu0 %v4131_v11  ;;  %3657 = vmatpush3.bf16.msra.mxu1 %v4132_v12 }
  0x9e   :  { %3638 = vmatprep.subr.bf16.mxu0 %v4638_v0  ;;  %3658 = vmatprep.subr.bf16.mxu1 %v4638_v0 }
  0xa1   :  { %3639 = vmatpush3.bf16.msra.mxu0 %v4133_v13  ;;  %3659 = vmatpush3.bf16.msra.mxu1 %v4134_v14 }
  0xa2   :  { %3640 = vmatprep.subr.bf16.mxu0 %v4638_v0  ;;  %3660 = vmatprep.subr.bf16.mxu1 %v4638_v0 }
  0xa5   :  { %3641 = vmatpush3.bf16.msra.mxu0 %v4135_v15  ;;  %3661 = vmatpush3.bf16.msra.mxu1 %v4136_v16  ;;  %v3178_v16 = vld [vmem:[%s5285_s2 + $0x2] ss:$0 sm:$0xff] }
  0xa6   :  { %3666 = vmatprep.subr.bf16.mxu0 %v4638_v0  ;;  %3686 = vmatprep.subr.bf16.mxu1 %v4638_v0 }
  0xa8   :  { %3643 = vmatmul.mubr.bf16.vlgmr.msra.gmra.mrb[0].mxu0 %v154_v19  ;;  %3663 = vmatmul.mubr.bf16.vlgmr.msra.gmra.mrb[0].mxu1 %v155_v20  ;;  %v3179_v19 = vld [vmem:[%s5285_s2 + $0x3] ss:$0 sm:$0xff] }
  0xa9   :  { %3667 = vmatpush3.bf16.msra.mxu0 %v4137_v21  ;;  %3687 = vmatpush3.bf16.msra.mxu1 %v4138_v22  ;;  %v4170_v20 = vld [vmem:[#allocation7 + $0xc0] sm:$0xff]  }
  0xaa   :  { %3668 = vmatprep.subr.bf16.mxu0 %v4638_v0  ;;  %3688 = vmatprep.subr.bf16.mxu1 %v4638_v0 }
  0xab   :  { %3682 = vmatprep.mubr.msk.bf16.mxu0 %vm4639_vm0, %v4638_v0  ;;  %3702 = vmatprep.mubr.msk.bf16.mxu1 %vm4639_vm0, %v4638_v0 }
  0xad   :  { %3669 = vmatpush3.bf16.msra.mxu0 %v4139_v23  ;;  %3689 = vmatpush3.bf16.msra.mxu1 %v4140_v24 }
  0xae   :  { %3670 = vmatprep.subr.bf16.mxu0 %v4638_v0  ;;  %3690 = vmatprep.subr.bf16.mxu1 %v4638_v0 }
  0xb1   :  { %3671 = vmatpush3.bf16.msra.mxu0 %v4141_v25  ;;  %3691 = vmatpush3.bf16.msra.mxu1 %v4142_v26 }
  0xb2   :  { %3672 = vmatprep.subr.bf16.mxu0 %v4638_v0  ;;  %3692 = vmatprep.subr.bf16.mxu1 %v4638_v0 }
  0xb5   :  { %3673 = vmatpush3.bf16.msra.mxu0 %v4143_v27  ;;  %3693 = vmatpush3.bf16.msra.mxu1 %v4144_v28 }
  0xb6   :  { %3674 = vmatprep.subr.bf16.mxu0 %v4638_v0  ;;  %3694 = vmatprep.subr.bf16.mxu1 %v4638_v0 }
  0xb9   :  { %3675 = vmatpush3.bf16.msra.mxu0 %v4145_v29  ;;  %3695 = vmatpush3.bf16.msra.mxu1 %v4146_v30  ;;  %v4171_v29 = vld [vmem:[#allocation7 + $0x88] sm:$0xff]  }
  0xba   :  { %3676 = vmatprep.subr.bf16.mxu0 %v4638_v0  ;;  %3696 = vmatprep.subr.bf16.mxu1 %v4638_v0 }
  0xbd   :  { %3677 = vmatpush3.bf16.msra.mxu0 %v4147_v31  ;;  %3697 = vmatpush3.bf16.msra.mxu1 %v4148_v32 }
  0xbe   :  { %3678 = vmatprep.subr.bf16.mxu0 %v4638_v0  ;;  %3698 = vmatprep.subr.bf16.mxu1 %v4638_v0 }
  0xc1   :  { %3679 = vmatpush3.bf16.msra.mxu0 %v4149_v33  ;;  %3699 = vmatpush3.bf16.msra.mxu1 %v4150_v34  ;;  %v4172_v33 = vld [vmem:[#allocation7 + $0xc8] sm:$0xff]  }
  0xc2   :  { %3680 = vmatprep.subr.bf16.mxu0 %v4638_v0  ;;  %3700 = vmatprep.subr.bf16.mxu1 %v4638_v0 }
  0xc5   :  { %3681 = vmatpush3.bf16.msra.mxu0 %v4151_v35  ;;  %3701 = vmatpush3.bf16.msra.mxu1 %v4152_v37  ;;  %v4174_v37 = vld [vmem:[#allocation7 + $0xd0] sm:$0xff]  }
  0xc6   :  { %3706 = vmatprep.subr.bf16.mxu0 %v4638_v0  ;;  %3726 = vmatprep.subr.bf16.mxu1 %v4638_v0 }
  0xc8   :  { %3683 = vmatmul.mubr.bf16.vlgmr.msra.gmra.mrb[4].mxu0 %v156_v39  ;;  %3703 = vmatmul.mubr.bf16.vlgmr.msra.gmra.mrb[4].mxu1 %v157_v40  ;;  %v4176_v39 = vld [vmem:[#allocation7 + $0xd8] sm:$0xff]   ;;  %v4177_v40 = vld [vmem:[#allocation7 + $0xa0] sm:$0xff]  }
  0xc9   :  { %3722 = vmatprep.mubr.msk.bf16.mxu0 %vm4639_vm0, %v4638_v0  ;;  %3742 = vmatprep.mubr.msk.bf16.mxu1 %vm4639_vm0, %v4638_v0 }
  0xca   :  { %3707 = vmatpush3.bf16.msra.mxu0 %v4153_v41  ;;  %3727 = vmatpush3.bf16.msra.mxu1 %v4154_v42  ;;  %v4178_v42 = vld [vmem:[#allocation7 + $0xe0] sm:$0xff]  }
  0xcb   :  { %3708 = vmatprep.subr.bf16.mxu0 %v4638_v0  ;;  %3728 = vmatprep.subr.bf16.mxu1 %v4638_v0 }
  0xce   :  { %3709 = vmatpush3.bf16.msra.mxu0 %v4155_v43  ;;  %3729 = vmatpush3.bf16.msra.mxu1 %v4156_v44 }
  0xcf   :  { %3710 = vmatprep.subr.bf16.mxu0 %v4638_v0  ;;  %3730 = vmatprep.subr.bf16.mxu1 %v4638_v0 }
  0xd2   :  { %3711 = vmatpush3.bf16.msra.mxu0 %v4157_v45  ;;  %3731 = vmatpush3.bf16.msra.mxu1 %v4158_v46  ;;  %v4179_v46 = vld [vmem:[#allocation7 + $0xa8] sm:$0xff]  }
  0xd3   :  { %3712 = vmatprep.subr.bf16.mxu0 %v4638_v0  ;;  %3732 = vmatprep.subr.bf16.mxu1 %v4638_v0 }
  0xd6   :  { %3713 = vmatpush3.bf16.msra.mxu0 %v4159_v47  ;;  %3733 = vmatpush3.bf16.msra.mxu1 %v4160_v48  ;;  %v4180_v47 = vld [vmem:[#allocation7 + $0xe8] sm:$0xff]   ;;  %v4181_v48 = vld [vmem:[#allocation7 + $0xb0] sm:$0xff]  }
  0xd7   :  { %3714 = vmatprep.subr.bf16.mxu0 %v4638_v0  ;;  %3734 = vmatprep.subr.bf16.mxu1 %v4638_v0 }
  0xda   :  { %3715 = vmatpush3.bf16.msra.mxu0 %v4161_v49  ;;  %3735 = vmatpush3.bf16.msra.mxu1 %v4162_v50  ;;  %v4182_v49 = vld [vmem:[#allocation7 + $0xf0] sm:$0xff]   ;;  %v4183_v50 = vld [vmem:[#allocation7 + $0xb8] sm:$0xff]  }
  0xdb   :  { %3716 = vmatprep.subr.bf16.mxu0 %v4638_v0  ;;  %3736 = vmatprep.subr.bf16.mxu1 %v4638_v0 }
  0xde   :  { %3717 = vmatpush3.bf16.msra.mxu0 %v4163_v51  ;;  %3737 = vmatpush3.bf16.msra.mxu1 %v4164_v52  ;;  %v4184_v51 = vld [vmem:[#allocation7 + $0xf8] sm:$0xff]  }
  0xdf   :  { %3718 = vmatprep.subr.bf16.mxu0 %v4638_v0  ;;  %3738 = vmatprep.subr.bf16.mxu1 %v4638_v0 }
  0xe2   :  { %3719 = vmatpush3.bf16.msra.mxu0 %v4165_v53  ;;  %3739 = vmatpush3.bf16.msra.mxu1 %v4166_v54 }
  0xe3   :  { %3720 = vmatprep.subr.bf16.mxu0 %v4638_v0  ;;  %3740 = vmatprep.subr.bf16.mxu1 %v4638_v0 }
  0xe6   :  { %3721 = vmatpush3.bf16.msra.mxu0 %v4167_v55  ;;  %3741 = vmatpush3.bf16.msra.mxu1 %v4168_v56 }
  0xe7   :  { %3746 = vmatprep.subr.bf16.mxu0 %v4638_v0  ;;  %3766 = vmatprep.subr.bf16.mxu1 %v4638_v0 }
 0x17b   :  { %v332_v59 = vpop.f32.mrb[0].mxu0  ;;  %v420_v61 = vpop.f32.mrb[0].mxu1 }
 0x17c   :  { %v333_v60 = vadd.f32 %v3176_v57, %v332_v59  ;;  %v3644_v62 = vpop.f32.mrb[1].mxu0  ;;  %v421_v63 = vadd.f32 %v3177_v58, %v420_v61  ;;  %v3664_v1 = vpop.f32.mrb[1].mxu1  ;;  %v4185_v58 = vld [vmem:[#allocation8] sm:$0xff]   ;;  %v4188_v61 = vld [vmem:[#allocation8 + $0x48] sm:$0xff]  }
 0x17d   :  { %v335_v2 = vpop.f32.mrb[2].mxu0  ;;  %v423_v4 = vpop.f32.mrb[2].mxu1  ;;  %v4186_v59 = vld [vmem:[#allocation8 + $0x40] sm:$0xff]   ;;  %v4189_v62 = vld [vmem:[#allocation8 + $0x10] sm:$0xff]   ;;  %v4191_v1 = vld [vmem:[#allocation8 + $0x18] sm:$0xff]  }
 0x17e   :  { %v3212_v3 = vmul.f32 -1.442695, %v333_v60  ;;  %v3645_v5 = vpop.f32.mrb[3].mxu0  ;;  %v3213_v6 = vmul.f32 -1.442695, %v421_v63  ;;  %v3665_v7 = vpop.f32.mrb[3].mxu1 }
 0x17f   :  { %v4192_v2 = vld [vmem:[#allocation8 + $0x58] sm:$0xff]   ;;  %v4194_v4 = vld [vmem:[#allocation8 + $0x60] sm:$0xff]   ;;  %v4195_v5 = vld [vmem:[#allocation8 + $0x28] sm:$0xff]  }
 0x180   :  { %4313 = vpow2.f32 %v3212_v3  ;;  %v4193_v3 = vld [vmem:[#allocation8 + $0x20] sm:$0xff]   ;;  %v4197_v7 = vld [vmem:[#allocation8 + $0x30] sm:$0xff]  }
 0x181   :  { %4315 = vpow2.f32 %v3213_v6  ;;  %v4196_v6 = vld [vmem:[#allocation8 + $0x68] sm:$0xff]  }
 0x18a   :  { %v4314_v8 = vpop.eup %4313 }
 0x18b   :  { %v4316_v9 = vpop.eup %4315  ;;  %v614_v10 = vadd.f32 1.0, %v4314_v8  ;;  %v4198_v8 = vld [vmem:[#allocation8 + $0x70] sm:$0xff]  }
 0x18c   :  { %v615_v11 = vadd.f32 1.0, %v4316_v9  ;;  %v4199_v9 = vld [vmem:[#allocation8 + $0x38] sm:$0xff]  }
 0x18d   :  { %4317 = vrcp.f32 %v614_v10  ;;  %v4200_v10 = vld [vmem:[#allocation8 + $0x78] sm:$0xff]  }
 0x18e   :  { %4319 = vrcp.f32 %v615_v11  ;;  %v3216_v11 = vld [vmem:[%s5287_s4] ss:$0 sm:$0xff] }
 0x197   :  { %v4318_v12 = vpop.eup %4317 }
 0x198   :  { %v4320_v13 = vpop.eup %4319  ;;  %v626_v14 = vmul.f32 %v4318_v12, %v333_v60  ;;  %v4187_v60 = vld [vmem:[#allocation8 + $0x8] sm:$0xff]   ;;  %v3217_v12 = vld [vmem:[%s5287_s4 + $0x1] ss:$0 sm:$0xff] }
 0x199   :  { %v627_v15 = vmul.f32 %v4320_v13, %v421_v63  ;;  %v4190_v63 = vld [vmem:[#allocation8 + $0x50] sm:$0xff]  }
 0x19a   :  { %v630_v18 = vpack.c.bf16 %v626_v14, %v626_v14 }
 0x19b   :  { %v631_v21 = vpack.c.bf16 %v627_v15, %v627_v15  ;;  %v508_v22 = vpop.f32.mrb[4].mxu0  ;;  %v596_v24 = vpop.f32.mrb[4].mxu1 }
 0x19c   :  { %v4913_v23 = vadd.f32 %v3178_v16, %v508_v22  ;;  %v3684_v25 = vpop.f32.mrb[5].mxu0  ;;  %3723 = vmatmul.mubr.bf16.vlgmr.msra.gmra.mrb[8].mxu0 %v630_v18  ;;  %v4915_v26 = vadd.f32 %v3179_v19, %v596_v24  ;;  %v3704_v27 = vpop.f32.mrb[5].mxu1 }
 0x19d   :  { %3743 = vmatmul.mubr.bf16.vlgmr.msra.gmra.mrb[8].mxu1 %v631_v21  ;;  %v511_v28 = vpop.f32.mrb[6].mxu0  ;;  %3747 = vmatpush3.bf16.msra.mxu0 %v4169_v17  ;;  %v599_v31 = vpop.f32.mrb[6].mxu1 }
 0x19e   :  { %v3214_v30 = vmul.f32 -1.442695, %v4913_v23  ;;  %3767 = vmatpush3.bf16.msra.mxu1 %v4170_v20  ;;  %v3685_v32 = vpop.f32.mrb[7].mxu0  ;;  %3748 = vmatprep.subr.bf16.mxu0 %v4638_v0  ;;  %v3215_v34 = vmul.f32 -1.442695, %v4915_v26  ;;  %v3705_v35 = vpop.f32.mrb[7].mxu1 }
 0x19f   :  { %3768 = vmatprep.subr.bf16.mxu1 %v4638_v0  ;;  %3762 = vmatprep.mubr.msk.bf16.mxu0 %vm4639_vm0, %v4638_v0 }
 0x1a0   :  { %4321 = vpow2.f32 %v3214_v30  ;;  %3782 = vmatprep.mubr.msk.bf16.mxu1 %vm4639_vm0, %v4638_v0 }
 0x1a1   :  { %4323 = vpow2.f32 %v3215_v34  ;;  %3749 = vmatpush3.bf16.msra.mxu0 %v4171_v29  ;;  %v4201_v34 = vld [vmem:[#allocation8 + $0x80] sm:$0xff]  }
 0x1a2   :  { %3769 = vmatpush3.bf16.msra.mxu1 %v4172_v33  ;;  %3750 = vmatprep.subr.bf16.mxu0 %v4638_v0  ;;  %v3218_v33 = vld [vmem:[%s5287_s4 + $0x2] ss:$0 sm:$0xff] }
 0x1a3   :  { %3770 = vmatprep.subr.bf16.mxu1 %v4638_v0 }
 0x1a5   :  { %3751 = vmatpush3.bf16.msra.mxu0 %v4173_v36  ;;  %v3219_v36 = vld [vmem:[%s5287_s4 + $0x3] ss:$0 sm:$0xff]  ;;  %s4640_s4 = smov [#allocation14]  }
 0x1a6   :  { %3771 = vmatpush3.bf16.msra.mxu1 %v4174_v37  ;;  %3752 = vmatprep.subr.bf16.mxu0 %v4638_v0  ;;  %v4202_v37 = vld [vmem:[#allocation8 + $0xc0] sm:$0xff]   ;;  %s3145_s29 = sshll.u32 %s4640_s4, 4  ;;  %s3146_s29 = int_to_ptr.vmem [resolvable:$true] %s3145_s29 }
 0x1a7   :  { %3772 = vmatprep.subr.bf16.mxu1 %v4638_v0  ;;  %s4571_s22 = scalar_lea.vmem %s3146_s29, 512  ;;  %p4576_p1 = scmp.lt.s32.totalorder %s3146_s29, %s3146_s29 }
 0x1a8   :  { %p4572_p0 = scmp.ne.s32.totalorder %s3146_s29, %s4571_s22  ;;  %p4577_p2 = scmp.lt.s32.totalorder %s4571_s22, %s4571_s22 }
 0x1a9   :  { %3753 = vmatpush3.bf16.msra.mxu0 %v4175_v38 }
 0x1aa   :  { %v4322_v41 = vpop.eup %4321  ;;  %3773 = vmatpush3.bf16.msra.mxu1 %v4176_v39  ;;  %3754 = vmatprep.subr.bf16.mxu0 %v4638_v0  ;;  %p4578_p3 = por %p4577_p2, %p4576_p1 }
 0x1ab   :  { %v4324_v43 = vpop.eup %4323  ;;  %v616_v44 = vadd.f32 1.0, %v4322_v41  ;;  %3774 = vmatprep.subr.bf16.mxu1 %v4638_v0 }
 0x1ac   :  { %v617_v45 = vadd.f32 1.0, %v4324_v43  ;;  %p4579_p4 = pnand %p4578_p3, %p4572_p0 }
 0x1ad   :  { %4325 = vrcp.f32 %v616_v44  ;;  %3755 = vmatpush3.bf16.msra.mxu0 %v4177_v40 }
 0x1ae   :  { %4327 = vrcp.f32 %v617_v45  ;;  %3775 = vmatpush3.bf16.msra.mxu1 %v4178_v42  ;;  %3756 = vmatprep.subr.bf16.mxu0 %v4638_v0 }
 0x1af   :  { %3776 = vmatprep.subr.bf16.mxu1 %v4638_v0 }
 0x1b1   :  { %3757 = vmatpush3.bf16.msra.mxu0 %v4179_v46  ;;  %v4203_v46 = vld [vmem:[#allocation8 + $0x88] sm:$0xff]  }
 0x1b2   :  { %3777 = vmatpush3.bf16.msra.mxu1 %v4180_v47  ;;  %3758 = vmatprep.subr.bf16.mxu0 %v4638_v0 }
 0x1b3   :  { %3778 = vmatprep.subr.bf16.mxu1 %v4638_v0 }
 0x1b5   :  { %3759 = vmatpush3.bf16.msra.mxu0 %v4181_v48 }
 0x1b6   :  { %3779 = vmatpush3.bf16.msra.mxu1 %v4182_v49  ;;  %3760 = vmatprep.subr.bf16.mxu0 %v4638_v0 }
 0x1b7   :  { %v4326_v52 = vpop.eup %4325  ;;  %3780 = vmatprep.subr.bf16.mxu1 %v4638_v0 }
 0x1b8   :  { %v4328_v53 = vpop.eup %4327  ;;  %v628_v54 = vmul.f32 %v4326_v52, %v4913_v23 }
 0x1b9   :  { %v629_v55 = vmul.f32 %v4328_v53, %v4915_v26  ;;  %3761 = vmatpush3.bf16.msra.mxu0 %v4183_v50  ;;  %v4204_v50 = vld [vmem:[#allocation8 + $0xc8] sm:$0xff]   ;;  %v4205_v53 = vld [vmem:[#allocation8 + $0x90] sm:$0xff]  }
 0x1ba   :  { %v632_v56 = vpack.c.bf16 %v628_v54, %v628_v54  ;;  %3781 = vmatpush3.bf16.msra.mxu1 %v4184_v51  ;;  %3786 = vmatprep.subr.bf16.mxu0 %v4638_v0  ;;  %v4206_v54 = vld [vmem:[#allocation8 + $0xd0] sm:$0xff]  }
 0x1bb   :  { %v633_v57 = vpack.c.bf16 %v629_v55, %v629_v55  ;;  %3806 = vmatprep.subr.bf16.mxu1 %v4638_v0  ;;  %v4207_v55 = vld [vmem:[#allocation8 + $0x98] sm:$0xff]  }
 0x1bc   :  { %3763 = vmatmul.mubr.bf16.vlgmr.msra.gmra.mrb[12].mxu0 %v632_v56  ;;  %v4208_v56 = vld [vmem:[#allocation8 + $0xd8] sm:$0xff]  }
 0x1bd   :  { %3783 = vmatmul.mubr.bf16.vlgmr.msra.gmra.mrb[12].mxu1 %v633_v57  ;;  %3802 = vmatprep.mubr.msk.bf16.mxu0 %vm4639_vm0, %v4638_v0  ;;  %v4209_v57 = vld [vmem:[#allocation8 + $0xa0] sm:$0xff]  }
 0x1be   :  { %3822 = vmatprep.mubr.msk.bf16.mxu1 %vm4639_vm0, %v4638_v0  ;;  %3787 = vmatpush3.bf16.msra.mxu0 %v4185_v58 }
 0x1bf   :  { %3807 = vmatpush3.bf16.msra.mxu1 %v4186_v59  ;;  %3788 = vmatprep.subr.bf16.mxu0 %v4638_v0  ;;  %v4210_v59 = vld [vmem:[#allocation8 + $0xe0] sm:$0xff]  }
 0x1c0   :  { %3808 = vmatprep.subr.bf16.mxu1 %v4638_v0 }
 0x1c2   :  { %3789 = vmatpush3.bf16.msra.mxu0 %v4187_v60 }
 0x1c3   :  { %3809 = vmatpush3.bf16.msra.mxu1 %v4188_v61  ;;  %3790 = vmatprep.subr.bf16.mxu0 %v4638_v0 }
 0x1c4   :  { %3810 = vmatprep.subr.bf16.mxu1 %v4638_v0 }
 0x1c6   :  { %3791 = vmatpush3.bf16.msra.mxu0 %v4189_v62 }
 0x1c7   :  { %3811 = vmatpush3.bf16.msra.mxu1 %v4190_v63  ;;  %3792 = vmatprep.subr.bf16.mxu0 %v4638_v0  ;;  %v4211_v63 = vld [vmem:[#allocation8 + $0xa8] sm:$0xff]  }
 0x1c8   :  { %3812 = vmatprep.subr.bf16.mxu1 %v4638_v0 }
 0x1ca   :  { %3793 = vmatpush3.bf16.msra.mxu0 %v4191_v1  ;;  %v4212_v1 = vld [vmem:[#allocation8 + $0xe8] sm:$0xff]  }
 0x1cb   :  { %3813 = vmatpush3.bf16.msra.mxu1 %v4192_v2  ;;  %3794 = vmatprep.subr.bf16.mxu0 %v4638_v0  ;;  %v4213_v2 = vld [vmem:[#allocation8 + $0xb0] sm:$0xff]  }
 0x1cc   :  { %3814 = vmatprep.subr.bf16.mxu1 %v4638_v0 }
 0x1ce   :  { %3795 = vmatpush3.bf16.msra.mxu0 %v4193_v3  ;;  %v4214_v3 = vld [vmem:[#allocation8 + $0xf0] sm:$0xff]  }
 0x1cf   :  { %3815 = vmatpush3.bf16.msra.mxu1 %v4194_v4  ;;  %3796 = vmatprep.subr.bf16.mxu0 %v4638_v0  ;;  %v4215_v4 = vld [vmem:[#allocation8 + $0xb8] sm:$0xff]  }
 0x1d0   :  { %3816 = vmatprep.subr.bf16.mxu1 %v4638_v0 }
 0x1d2   :  { %3797 = vmatpush3.bf16.msra.mxu0 %v4195_v5  ;;  %v4216_v5 = vld [vmem:[#allocation8 + $0xf8] sm:$0xff]  }
 0x1d3   :  { %3817 = vmatpush3.bf16.msra.mxu1 %v4196_v6  ;;  %3798 = vmatprep.subr.bf16.mxu0 %v4638_v0 }
 0x1d4   :  { %3818 = vmatprep.subr.bf16.mxu1 %v4638_v0 }
 0x1d6   :  { %3799 = vmatpush3.bf16.msra.mxu0 %v4197_v7 }
 0x1d7   :  { %3819 = vmatpush3.bf16.msra.mxu1 %v4198_v8  ;;  %3800 = vmatprep.subr.bf16.mxu0 %v4638_v0 }
 0x1d8   :  { %3820 = vmatprep.subr.bf16.mxu1 %v4638_v0 }
 0x1da   :  { %3801 = vmatpush3.bf16.msra.mxu0 %v4199_v9 }
 0x1db   :  { %3821 = vmatpush3.bf16.msra.mxu1 %v4200_v10  ;;  %3826 = vmatprep.subr.bf16.mxu0 %v4638_v0 }
 0x1dc   :  { %3846 = vmatprep.subr.bf16.mxu1 %v4638_v0 }
 0x26f   :  { %v808_v13 = vpop.f32.mrb[8].mxu0 }
 0x270   :  { %v809_v14 = vadd.f32 %v3216_v11, %v808_v13  ;;  %v896_v15 = vpop.f32.mrb[8].mxu1  ;;  %v3724_v16 = vpop.f32.mrb[9].mxu0  ;;  %v4218_v13 = vld [vmem:[#allocation10 + $0x40] sm:$0xff]  }
 0x271   :  { %v897_v17 = vadd.f32 %v3217_v12, %v896_v15  ;;  %v3744_v18 = vpop.f32.mrb[9].mxu1  ;;  %v811_v19 = vpop.f32.mrb[10].mxu0  ;;  %v4217_v12 = vld [vmem:[#allocation10] sm:$0xff]   ;;  %v4220_v15 = vld [vmem:[#allocation10 + $0x48] sm:$0xff]   ;;  %v4221_v16 = vld [vmem:[#allocation10 + $0x10] sm:$0xff]  }
 0x272   :  { %v3252_v20 = vmul.f32 -1.442695, %v809_v14  ;;  %v899_v21 = vpop.f32.mrb[10].mxu1  ;;  %v3725_v22 = vpop.f32.mrb[11].mxu0  ;;  %v4223_v18 = vld [vmem:[#allocation10 + $0x18] sm:$0xff]  }
 0x273   :  { %v3253_v23 = vmul.f32 -1.442695, %v897_v17  ;;  %v3745_v24 = vpop.f32.mrb[11].mxu1  ;;  %v4224_v19 = vld [vmem:[#allocation10 + $0x58] sm:$0xff]   ;;  %v4226_v21 = vld [vmem:[#allocation10 + $0x60] sm:$0xff]   ;;  %v4227_v22 = vld [vmem:[#allocation10 + $0x28] sm:$0xff]  }
 0x274   :  { %4329 = vpow2.f32 %v3252_v20  ;;  %v4225_v20 = vld [vmem:[#allocation10 + $0x20] sm:$0xff]   ;;  %v4229_v24 = vld [vmem:[#allocation10 + $0x30] sm:$0xff]  }
 0x275   :  { %4331 = vpow2.f32 %v3253_v23  ;;  %v4228_v23 = vld [vmem:[#allocation10 + $0x68] sm:$0xff]  }
 0x27e   :  { %v4330_v25 = vpop.eup %4329 }
 0x27f   :  { %v4332_v26 = vpop.eup %4331  ;;  %v1090_v27 = vadd.f32 1.0, %v4330_v25  ;;  %v4230_v25 = vld [vmem:[#allocation10 + $0x70] sm:$0xff]  }
 0x280   :  { %v1091_v28 = vadd.f32 1.0, %v4332_v26  ;;  %v4231_v26 = vld [vmem:[#allocation10 + $0x38] sm:$0xff]  }
 0x281   :  { %4333 = vrcp.f32 %v1090_v27  ;;  %v4232_v27 = vld [vmem:[#allocation10 + $0x78] sm:$0xff]  }
 0x282   :  { %4335 = vrcp.f32 %v1091_v28  ;;  %v3256_v28 = vld [vmem:[%s5289_s6] ss:$0 sm:$0xff] }
 0x28b   :  { %v4334_v29 = vpop.eup %4333 }
 0x28c   :  { %v4336_v30 = vpop.eup %4335  ;;  %v1102_v31 = vmul.f32 %v4334_v29, %v809_v14  ;;  %v4219_v14 = vld [vmem:[#allocation10 + $0x8] sm:$0xff]   ;;  %v3257_v29 = vld [vmem:[%s5289_s6 + $0x1] ss:$0 sm:$0xff] }
 0x28d   :  { %v1103_v32 = vmul.f32 %v4336_v30, %v897_v17  ;;  %v4222_v17 = vld [vmem:[#allocation10 + $0x50] sm:$0xff]  }
 0x28e   :  { %v1106_v35 = vpack.c.bf16 %v1102_v31, %v1102_v31 }
 0x28f   :  { %v1107_v38 = vpack.c.bf16 %v1103_v32, %v1103_v32  ;;  %v984_v39 = vpop.f32.mrb[12].mxu0 }
 0x290   :  { %v4973_v40 = vadd.f32 %v3218_v33, %v984_v39  ;;  %v1072_v41 = vpop.f32.mrb[12].mxu1  ;;  %v3764_v42 = vpop.f32.mrb[13].mxu0  ;;  %3803 = vmatmul.mubr.bf16.vlgmr.msra.gmra.mrb[16].mxu0 %v1106_v35 }
 0x291   :  { %v4975_v43 = vadd.f32 %v3219_v36, %v1072_v41  ;;  %v3784_v44 = vpop.f32.mrb[13].mxu1  ;;  %3823 = vmatmul.mubr.bf16.vlgmr.msra.gmra.mrb[16].mxu1 %v1107_v38  ;;  %v987_v45 = vpop.f32.mrb[14].mxu0  ;;  %3827 = vmatpush3.bf16.msra.mxu0 %v4201_v34 }
 0x292   :  { %v3254_v47 = vmul.f32 -1.442695, %v4973_v40  ;;  %v1075_v48 = vpop.f32.mrb[14].mxu1  ;;  %3847 = vmatpush3.bf16.msra.mxu1 %v4202_v37  ;;  %v3765_v49 = vpop.f32.mrb[15].mxu0  ;;  %3828 = vmatprep.subr.bf16.mxu0 %v4638_v0 }
 0x293   :  { %v3255_v51 = vmul.f32 -1.442695, %v4975_v43  ;;  %v3785_v52 = vpop.f32.mrb[15].mxu1  ;;  %3848 = vmatprep.subr.bf16.mxu1 %v4638_v0  ;;  %3842 = vmatprep.mubr.msk.bf16.mxu0 %vm4639_vm0, %v4638_v0 }
 0x294   :  { %4337 = vpow2.f32 %v3254_v47  ;;  %3862 = vmatprep.mubr.msk.bf16.mxu1 %vm4639_vm0, %v4638_v0 }
 0x295   :  { %4339 = vpow2.f32 %v3255_v51  ;;  %3829 = vmatpush3.bf16.msra.mxu0 %v4203_v46  ;;  %v4233_v51 = vld [vmem:[#allocation10 + $0x80] sm:$0xff]  }
 0x296   :  { %3849 = vmatpush3.bf16.msra.mxu1 %v4204_v50  ;;  %3830 = vmatprep.subr.bf16.mxu0 %v4638_v0  ;;  %v3258_v50 = vld [vmem:[%s5289_s6 + $0x2] ss:$0 sm:$0xff] }
 0x297   :  { %3850 = vmatprep.subr.bf16.mxu1 %v4638_v0 }
 0x299   :  { %3831 = vmatpush3.bf16.msra.mxu0 %v4205_v53  ;;  %v3259_v53 = vld [vmem:[%s5289_s6 + $0x3] ss:$0 sm:$0xff] }
 0x29a   :  { %3851 = vmatpush3.bf16.msra.mxu1 %v4206_v54  ;;  %3832 = vmatprep.subr.bf16.mxu0 %v4638_v0  ;;  %v4234_v54 = vld [vmem:[#allocation10 + $0xc0] sm:$0xff]  }
 0x29b   :  { %3852 = vmatprep.subr.bf16.mxu1 %v4638_v0 }
 0x29d   :  { %3833 = vmatpush3.bf16.msra.mxu0 %v4207_v55 }
 0x29e   :  { %v4338_v58 = vpop.eup %4337  ;;  %3853 = vmatpush3.bf16.msra.mxu1 %v4208_v56  ;;  %3834 = vmatprep.subr.bf16.mxu0 %v4638_v0 }
 0x29f   :  { %v4340_v60 = vpop.eup %4339  ;;  %v1092_v61 = vadd.f32 1.0, %v4338_v58  ;;  %3854 = vmatprep.subr.bf16.mxu1 %v4638_v0 }
 0x2a0   :  { %v1093_v62 = vadd.f32 1.0, %v4340_v60 }
 0x2a1   :  { %4341 = vrcp.f32 %v1092_v61  ;;  %3835 = vmatpush3.bf16.msra.mxu0 %v4209_v57 }
 0x2a2   :  { %4343 = vrcp.f32 %v1093_v62  ;;  %3855 = vmatpush3.bf16.msra.mxu1 %v4210_v59  ;;  %3836 = vmatprep.subr.bf16.mxu0 %v4638_v0 }
 0x2a3   :  { %3856 = vmatprep.subr.bf16.mxu1 %v4638_v0 }
 0x2a5   :  { %3837 = vmatpush3.bf16.msra.mxu0 %v4211_v63  ;;  %v4235_v63 = vld [vmem:[#allocation10 + $0x88] sm:$0xff]  }
 0x2a6   :  { %3857 = vmatpush3.bf16.msra.mxu1 %v4212_v1  ;;  %3838 = vmatprep.subr.bf16.mxu0 %v4638_v0 }
 0x2a7   :  { %3858 = vmatprep.subr.bf16.mxu1 %v4638_v0 }
 0x2a9   :  { %3839 = vmatpush3.bf16.msra.mxu0 %v4213_v2 }
 0x2aa   :  { %3859 = vmatpush3.bf16.msra.mxu1 %v4214_v3  ;;  %3840 = vmatprep.subr.bf16.mxu0 %v4638_v0 }
 0x2ab   :  { %v4342_v6 = vpop.eup %4341  ;;  %3860 = vmatprep.subr.bf16.mxu1 %v4638_v0 }
 0x2ac   :  { %v4344_v7 = vpop.eup %4343  ;;  %v1104_v8 = vmul.f32 %v4342_v6, %v4973_v40 }
 0x2ad   :  { %v1105_v9 = vmul.f32 %v4344_v7, %v4975_v43  ;;  %3841 = vmatpush3.bf16.msra.mxu0 %v4215_v4  ;;  %v4236_v4 = vld [vmem:[#allocation10 + $0xc8] sm:$0xff]   ;;  %v4237_v7 = vld [vmem:[#allocation10 + $0x90] sm:$0xff]  }
 0x2ae   :  { %v1108_v10 = vpack.c.bf16 %v1104_v8, %v1104_v8  ;;  %3861 = vmatpush3.bf16.msra.mxu1 %v4216_v5  ;;  %3866 = vmatprep.subr.bf16.mxu0 %v4638_v0  ;;  %v4238_v8 = vld [vmem:[#allocation10 + $0xd0] sm:$0xff]  }
 0x2af   :  { %v1109_v11 = vpack.c.bf16 %v1105_v9, %v1105_v9  ;;  %3886 = vmatprep.subr.bf16.mxu1 %v4638_v0  ;;  %v4239_v9 = vld [vmem:[#allocation10 + $0x98] sm:$0xff]  }
 0x2b0   :  { %3843 = vmatmul.mubr.bf16.vlgmr.msra.gmra.mrb[20].mxu0 %v1108_v10  ;;  %v4240_v10 = vld [vmem:[#allocation10 + $0xd8] sm:$0xff]  }
 0x2b1   :  { %3863 = vmatmul.mubr.bf16.vlgmr.msra.gmra.mrb[20].mxu1 %v1109_v11  ;;  %3882 = vmatprep.mubr.msk.bf16.mxu0 %vm4639_vm0, %v4638_v0  ;;  %v4241_v11 = vld [vmem:[#allocation10 + $0xa0] sm:$0xff]  }
 0x2b2   :  { %3902 = vmatprep.mubr.msk.bf16.mxu1 %vm4639_vm0, %v4638_v0  ;;  %3867 = vmatpush3.bf16.msra.mxu0 %v4217_v12 }
 0x2b3   :  { %3887 = vmatpush3.bf16.msra.mxu1 %v4218_v13  ;;  %3868 = vmatprep.subr.bf16.mxu0 %v4638_v0  ;;  %v4242_v13 = vld [vmem:[#allocation10 + $0xe0] sm:$0xff]  }
 0x2b4   :  { %3888 = vmatprep.subr.bf16.mxu1 %v4638_v0 }
 0x2b6   :  { %3869 = vmatpush3.bf16.msra.mxu0 %v4219_v14 }
 0x2b7   :  { %3889 = vmatpush3.bf16.msra.mxu1 %v4220_v15  ;;  %3870 = vmatprep.subr.bf16.mxu0 %v4638_v0 }
 0x2b8   :  { %3890 = vmatprep.subr.bf16.mxu1 %v4638_v0 }
 0x2ba   :  { %3871 = vmatpush3.bf16.msra.mxu0 %v4221_v16 }
 0x2bb   :  { %3891 = vmatpush3.bf16.msra.mxu1 %v4222_v17  ;;  %3872 = vmatprep.subr.bf16.mxu0 %v4638_v0  ;;  %v4243_v17 = vld [vmem:[#allocation10 + $0xa8] sm:$0xff]  }
 0x2bc   :  { %3892 = vmatprep.subr.bf16.mxu1 %v4638_v0 }
 0x2be   :  { %3873 = vmatpush3.bf16.msra.mxu0 %v4223_v18  ;;  %v4244_v18 = vld [vmem:[#allocation10 + $0xe8] sm:$0xff]  }
 0x2bf   :  { %3893 = vmatpush3.bf16.msra.mxu1 %v4224_v19  ;;  %3874 = vmatprep.subr.bf16.mxu0 %v4638_v0  ;;  %v4245_v19 = vld [vmem:[#allocation10 + $0xb0] sm:$0xff]  }
 0x2c0   :  { %3894 = vmatprep.subr.bf16.mxu1 %v4638_v0 }
 0x2c2   :  { %3875 = vmatpush3.bf16.msra.mxu0 %v4225_v20  ;;  %v4246_v20 = vld [vmem:[#allocation10 + $0xf0] sm:$0xff]  }
 0x2c3   :  { %3895 = vmatpush3.bf16.msra.mxu1 %v4226_v21  ;;  %3876 = vmatprep.subr.bf16.mxu0 %v4638_v0  ;;  %v4247_v21 = vld [vmem:[#allocation10 + $0xb8] sm:$0xff]  }
 0x2c4   :  { %3896 = vmatprep.subr.bf16.mxu1 %v4638_v0 }
 0x2c6   :  { %3877 = vmatpush3.bf16.msra.mxu0 %v4227_v22  ;;  %v4248_v22 = vld [vmem:[#allocation10 + $0xf8] sm:$0xff]  }
 0x2c7   :  { %3897 = vmatpush3.bf16.msra.mxu1 %v4228_v23  ;;  %3878 = vmatprep.subr.bf16.mxu0 %v4638_v0 }
 0x2c8   :  { %3898 = vmatprep.subr.bf16.mxu1 %v4638_v0 }
 0x2ca   :  { %3879 = vmatpush3.bf16.msra.mxu0 %v4229_v24 }
 0x2cb   :  { %3899 = vmatpush3.bf16.msra.mxu1 %v4230_v25  ;;  %3880 = vmatprep.subr.bf16.mxu0 %v4638_v0 }
 0x2cc   :  { %3900 = vmatprep.subr.bf16.mxu1 %v4638_v0 }
 0x2ce   :  { %3881 = vmatpush3.bf16.msra.mxu0 %v4231_v26 }
 0x2cf   :  { %3901 = vmatpush3.bf16.msra.mxu1 %v4232_v27  ;;  %3906 = vmatprep.subr.bf16.mxu0 %v4638_v0 }
 0x2d0   :  { %3926 = vmatprep.subr.bf16.mxu1 %v4638_v0 }
 0x363   :  { %v1284_v30 = vpop.f32.mrb[16].mxu0 }
 0x364   :  { %v1285_v31 = vadd.f32 %v3256_v28, %v1284_v30  ;;  %v1372_v32 = vpop.f32.mrb[16].mxu1  ;;  %v3804_v33 = vpop.f32.mrb[17].mxu0  ;;  %v4250_v30 = vld [vmem:[#allocation11 + $0x40] sm:$0xff]  }
 0x365   :  { %v1373_v34 = vadd.f32 %v3257_v29, %v1372_v32  ;;  %v3824_v35 = vpop.f32.mrb[17].mxu1  ;;  %v1287_v36 = vpop.f32.mrb[18].mxu0  ;;  %v4249_v29 = vld [vmem:[#allocation11] sm:$0xff]   ;;  %v4252_v32 = vld [vmem:[#allocation11 + $0x48] sm:$0xff]   ;;  %v4253_v33 = vld [vmem:[#allocation11 + $0x10] sm:$0xff]  }
 0x366   :  { %v3292_v37 = vmul.f32 -1.442695, %v1285_v31  ;;  %v1375_v38 = vpop.f32.mrb[18].mxu1  ;;  %v3805_v39 = vpop.f32.mrb[19].mxu0  ;;  %v4255_v35 = vld [vmem:[#allocation11 + $0x18] sm:$0xff]  }
 0x367   :  { %v3293_v40 = vmul.f32 -1.442695, %v1373_v34  ;;  %v3825_v41 = vpop.f32.mrb[19].mxu1  ;;  %v4256_v36 = vld [vmem:[#allocation11 + $0x58] sm:$0xff]   ;;  %v4258_v38 = vld [vmem:[#allocation11 + $0x60] sm:$0xff]   ;;  %v4259_v39 = vld [vmem:[#allocation11 + $0x28] sm:$0xff]  }
 0x368   :  { %4345 = vpow2.f32 %v3292_v37  ;;  %v4257_v37 = vld [vmem:[#allocation11 + $0x20] sm:$0xff]   ;;  %v4261_v41 = vld [vmem:[#allocation11 + $0x30] sm:$0xff]  }
 0x369   :  { %4347 = vpow2.f32 %v3293_v40  ;;  %v4260_v40 = vld [vmem:[#allocation11 + $0x68] sm:$0xff]  }
 0x372   :  { %v4346_v42 = vpop.eup %4345 }
 0x373   :  { %v4348_v43 = vpop.eup %4347  ;;  %v1566_v44 = vadd.f32 1.0, %v4346_v42  ;;  %v4262_v42 = vld [vmem:[#allocation11 + $0x70] sm:$0xff]  }
 0x374   :  { %v1567_v45 = vadd.f32 1.0, %v4348_v43  ;;  %v4263_v43 = vld [vmem:[#allocation11 + $0x38] sm:$0xff]  }
 0x375   :  { %4349 = vrcp.f32 %v1566_v44  ;;  %v4264_v44 = vld [vmem:[#allocation11 + $0x78] sm:$0xff]  }
 0x376   :  { %4351 = vrcp.f32 %v1567_v45  ;;  %v3296_v45 = vld [vmem:[%s5291_s8] ss:$0 sm:$0xff] }
 0x37f   :  { %v4350_v46 = vpop.eup %4349 }
 0x380   :  { %v4352_v47 = vpop.eup %4351  ;;  %v1578_v48 = vmul.f32 %v4350_v46, %v1285_v31  ;;  %v4251_v31 = vld [vmem:[#allocation11 + $0x8] sm:$0xff]   ;;  %v3297_v46 = vld [vmem:[%s5291_s8 + $0x1] ss:$0 sm:$0xff] }
 0x381   :  { %v1579_v49 = vmul.f32 %v4352_v47, %v1373_v34  ;;  %v4254_v34 = vld [vmem:[#allocation11 + $0x50] sm:$0xff]  }
 0x382   :  { %v1582_v52 = vpack.c.bf16 %v1578_v48, %v1578_v48 }
 0x383   :  { %v1583_v55 = vpack.c.bf16 %v1579_v49, %v1579_v49  ;;  %v1460_v56 = vpop.f32.mrb[20].mxu0 }
 0x384   :  { %v5033_v57 = vadd.f32 %v3258_v50, %v1460_v56  ;;  %v1548_v58 = vpop.f32.mrb[20].mxu1  ;;  %v3844_v59 = vpop.f32.mrb[21].mxu0  ;;  %3883 = vmatmul.mubr.bf16.vlgmr.msra.gmra.mrb[24].mxu0 %v1582_v52 }
 0x385   :  { %v5035_v60 = vadd.f32 %v3259_v53, %v1548_v58  ;;  %v3864_v61 = vpop.f32.mrb[21].mxu1  ;;  %3903 = vmatmul.mubr.bf16.vlgmr.msra.gmra.mrb[24].mxu1 %v1583_v55  ;;  %v1463_v62 = vpop.f32.mrb[22].mxu0  ;;  %3907 = vmatpush3.bf16.msra.mxu0 %v4233_v51 }
 0x386   :  { %v3294_v1 = vmul.f32 -1.442695, %v5033_v57  ;;  %v1551_v2 = vpop.f32.mrb[22].mxu1  ;;  %3927 = vmatpush3.bf16.msra.mxu1 %v4234_v54  ;;  %v3845_v3 = vpop.f32.mrb[23].mxu0  ;;  %3908 = vmatprep.subr.bf16.mxu0 %v4638_v0 }
 0x387   :  { %v3295_v5 = vmul.f32 -1.442695, %v5035_v60  ;;  %v3865_v6 = vpop.f32.mrb[23].mxu1  ;;  %3928 = vmatprep.subr.bf16.mxu1 %v4638_v0  ;;  %3922 = vmatprep.mubr.msk.bf16.mxu0 %vm4639_vm0, %v4638_v0 }
 0x388   :  { %4353 = vpow2.f32 %v3294_v1  ;;  %3942 = vmatprep.mubr.msk.bf16.mxu1 %vm4639_vm0, %v4638_v0 }
 0x389   :  { %4355 = vpow2.f32 %v3295_v5  ;;  %3909 = vmatpush3.bf16.msra.mxu0 %v4235_v63  ;;  %v4265_v5 = vld [vmem:[#allocation11 + $0x80] sm:$0xff]  }
 0x38a   :  { %3929 = vmatpush3.bf16.msra.mxu1 %v4236_v4  ;;  %3910 = vmatprep.subr.bf16.mxu0 %v4638_v0  ;;  %v3298_v4 = vld [vmem:[%s5291_s8 + $0x2] ss:$0 sm:$0xff] }
 0x38b   :  { %3930 = vmatprep.subr.bf16.mxu1 %v4638_v0 }
 0x38d   :  { %3911 = vmatpush3.bf16.msra.mxu0 %v4237_v7  ;;  %v3299_v7 = vld [vmem:[%s5291_s8 + $0x3] ss:$0 sm:$0xff] }
 0x38e   :  { %3931 = vmatpush3.bf16.msra.mxu1 %v4238_v8  ;;  %3912 = vmatprep.subr.bf16.mxu0 %v4638_v0  ;;  %v4266_v8 = vld [vmem:[#allocation11 + $0xc0] sm:$0xff]  }
 0x38f   :  { %3932 = vmatprep.subr.bf16.mxu1 %v4638_v0 }
 0x391   :  { %3913 = vmatpush3.bf16.msra.mxu0 %v4239_v9 }
 0x392   :  { %v4354_v12 = vpop.eup %4353  ;;  %3933 = vmatpush3.bf16.msra.mxu1 %v4240_v10  ;;  %3914 = vmatprep.subr.bf16.mxu0 %v4638_v0 }
 0x393   :  { %v4356_v14 = vpop.eup %4355  ;;  %v1568_v15 = vadd.f32 1.0, %v4354_v12  ;;  %3934 = vmatprep.subr.bf16.mxu1 %v4638_v0 }
 0x394   :  { %v1569_v16 = vadd.f32 1.0, %v4356_v14 }
 0x395   :  { %4357 = vrcp.f32 %v1568_v15  ;;  %3915 = vmatpush3.bf16.msra.mxu0 %v4241_v11 }
 0x396   :  { %4359 = vrcp.f32 %v1569_v16  ;;  %3935 = vmatpush3.bf16.msra.mxu1 %v4242_v13  ;;  %3916 = vmatprep.subr.bf16.mxu0 %v4638_v0 }
 0x397   :  { %3936 = vmatprep.subr.bf16.mxu1 %v4638_v0 }
 0x399   :  { %3917 = vmatpush3.bf16.msra.mxu0 %v4243_v17  ;;  %v4267_v17 = vld [vmem:[#allocation11 + $0x88] sm:$0xff]  }
 0x39a   :  { %3937 = vmatpush3.bf16.msra.mxu1 %v4244_v18  ;;  %3918 = vmatprep.subr.bf16.mxu0 %v4638_v0 }
 0x39b   :  { %3938 = vmatprep.subr.bf16.mxu1 %v4638_v0 }
 0x39d   :  { %3919 = vmatpush3.bf16.msra.mxu0 %v4245_v19 }
 0x39e   :  { %3939 = vmatpush3.bf16.msra.mxu1 %v4246_v20  ;;  %3920 = vmatprep.subr.bf16.mxu0 %v4638_v0 }
 0x39f   :  { %v4358_v23 = vpop.eup %4357  ;;  %3940 = vmatprep.subr.bf16.mxu1 %v4638_v0 }
 0x3a0   :  { %v4360_v24 = vpop.eup %4359  ;;  %v1580_v25 = vmul.f32 %v4358_v23, %v5033_v57 }
 0x3a1   :  { %v1581_v26 = vmul.f32 %v4360_v24, %v5035_v60  ;;  %3921 = vmatpush3.bf16.msra.mxu0 %v4247_v21  ;;  %v4268_v21 = vld [vmem:[#allocation11 + $0xc8] sm:$0xff]   ;;  %v4269_v24 = vld [vmem:[#allocation11 + $0x90] sm:$0xff]  }
 0x3a2   :  { %v1584_v27 = vpack.c.bf16 %v1580_v25, %v1580_v25  ;;  %3941 = vmatpush3.bf16.msra.mxu1 %v4248_v22  ;;  %3946 = vmatprep.subr.bf16.mxu0 %v4638_v0  ;;  %v4270_v25 = vld [vmem:[#allocation11 + $0xd0] sm:$0xff]  }
 0x3a3   :  { %v1585_v28 = vpack.c.bf16 %v1581_v26, %v1581_v26  ;;  %3966 = vmatprep.subr.bf16.mxu1 %v4638_v0  ;;  %v4271_v26 = vld [vmem:[#allocation11 + $0x98] sm:$0xff]  }
 0x3a4   :  { %3923 = vmatmul.mubr.bf16.vlgmr.msra.gmra.mrb[28].mxu0 %v1584_v27  ;;  %v4272_v27 = vld [vmem:[#allocation11 + $0xd8] sm:$0xff]  }
 0x3a5   :  { %3943 = vmatmul.mubr.bf16.vlgmr.msra.gmra.mrb[28].mxu1 %v1585_v28  ;;  %3962 = vmatprep.mubr.msk.bf16.mxu0 %vm4639_vm0, %v4638_v0  ;;  %v4273_v28 = vld [vmem:[#allocation11 + $0xa0] sm:$0xff]  }
 0x3a6   :  { %3982 = vmatprep.mubr.msk.bf16.mxu1 %vm4639_vm0, %v4638_v0  ;;  %3947 = vmatpush3.bf16.msra.mxu0 %v4249_v29 }
 0x3a7   :  { %3967 = vmatpush3.bf16.msra.mxu1 %v4250_v30  ;;  %3948 = vmatprep.subr.bf16.mxu0 %v4638_v0  ;;  %v4274_v30 = vld [vmem:[#allocation11 + $0xe0] sm:$0xff]  }
 0x3a8   :  { %3968 = vmatprep.subr.bf16.mxu1 %v4638_v0 }
 0x3aa   :  { %3949 = vmatpush3.bf16.msra.mxu0 %v4251_v31 }
 0x3ab   :  { %3969 = vmatpush3.bf16.msra.mxu1 %v4252_v32  ;;  %3950 = vmatprep.subr.bf16.mxu0 %v4638_v0 }
 0x3ac   :  { %3970 = vmatprep.subr.bf16.mxu1 %v4638_v0 }
 0x3ae   :  { %3951 = vmatpush3.bf16.msra.mxu0 %v4253_v33 }
 0x3af   :  { %3971 = vmatpush3.bf16.msra.mxu1 %v4254_v34  ;;  %3952 = vmatprep.subr.bf16.mxu0 %v4638_v0  ;;  %v4275_v34 = vld [vmem:[#allocation11 + $0xa8] sm:$0xff]  }
 0x3b0   :  { %3972 = vmatprep.subr.bf16.mxu1 %v4638_v0 }
 0x3b2   :  { %3953 = vmatpush3.bf16.msra.mxu0 %v4255_v35  ;;  %v4276_v35 = vld [vmem:[#allocation11 + $0xe8] sm:$0xff]  }
 0x3b3   :  { %3973 = vmatpush3.bf16.msra.mxu1 %v4256_v36  ;;  %3954 = vmatprep.subr.bf16.mxu0 %v4638_v0  ;;  %v4277_v36 = vld [vmem:[#allocation11 + $0xb0] sm:$0xff]  }
 0x3b4   :  { %3974 = vmatprep.subr.bf16.mxu1 %v4638_v0 }
 0x3b6   :  { %3955 = vmatpush3.bf16.msra.mxu0 %v4257_v37  ;;  %v4278_v37 = vld [vmem:[#allocation11 + $0xf0] sm:$0xff]  }
 0x3b7   :  { %3975 = vmatpush3.bf16.msra.mxu1 %v4258_v38  ;;  %3956 = vmatprep.subr.bf16.mxu0 %v4638_v0  ;;  %v4279_v38 = vld [vmem:[#allocation11 + $0xb8] sm:$0xff]  }
 0x3b8   :  { %3976 = vmatprep.subr.bf16.mxu1 %v4638_v0 }
 0x3ba   :  { %3957 = vmatpush3.bf16.msra.mxu0 %v4259_v39  ;;  %v4280_v39 = vld [vmem:[#allocation11 + $0xf8] sm:$0xff]  }
 0x3bb   :  { %3977 = vmatpush3.bf16.msra.mxu1 %v4260_v40  ;;  %3958 = vmatprep.subr.bf16.mxu0 %v4638_v0 }
 0x3bc   :  { %3978 = vmatprep.subr.bf16.mxu1 %v4638_v0 }
 0x3be   :  { %3959 = vmatpush3.bf16.msra.mxu0 %v4261_v41 }
 0x3bf   :  { %3979 = vmatpush3.bf16.msra.mxu1 %v4262_v42  ;;  %3960 = vmatprep.subr.bf16.mxu0 %v4638_v0 }
 0x3c0   :  { %3980 = vmatprep.subr.bf16.mxu1 %v4638_v0 }
 0x3c2   :  { %3961 = vmatpush3.bf16.msra.mxu0 %v4263_v43 }
 0x3c3   :  { %3981 = vmatpush3.bf16.msra.mxu1 %v4264_v44  ;;  %3986 = vmatprep.subr.bf16.mxu0 %v4638_v0  ;;  %v4281_v44 = vld [vmem:[#allocation13] sm:$0xff]  }
 0x3c4   :  { %4006 = vmatprep.subr.bf16.mxu1 %v4638_v0 }
 0x457   :  { %v1760_v47 = vpop.f32.mrb[24].mxu0 }
 0x458   :  { %v1761_v48 = vadd.f32 %v3296_v45, %v1760_v47  ;;  %v1848_v49 = vpop.f32.mrb[24].mxu1  ;;  %v3884_v50 = vpop.f32.mrb[25].mxu0 }
 0x459   :  { %v1849_v51 = vadd.f32 %v3297_v46, %v1848_v49  ;;  %v3904_v52 = vpop.f32.mrb[25].mxu1  ;;  %v1763_v53 = vpop.f32.mrb[26].mxu0  ;;  %v4282_v46 = vld [vmem:[#allocation13 + $0x40] sm:$0xff]   ;;  %v4284_v49 = vld [vmem:[#allocation13 + $0x48] sm:$0xff]   ;;  %v4285_v50 = vld [vmem:[#allocation13 + $0x10] sm:$0xff]  }
 0x45a   :  { %v3332_v54 = vmul.f32 -1.442695, %v1761_v48  ;;  %v1851_v55 = vpop.f32.mrb[26].mxu1  ;;  %v3885_v56 = vpop.f32.mrb[27].mxu0  ;;  %v4287_v52 = vld [vmem:[#allocation13 + $0x18] sm:$0xff]  }
 0x45b   :  { %v3333_v57 = vmul.f32 -1.442695, %v1849_v51  ;;  %v3905_v58 = vpop.f32.mrb[27].mxu1  ;;  %v4288_v53 = vld [vmem:[#allocation13 + $0x58] sm:$0xff]   ;;  %v4290_v55 = vld [vmem:[#allocation13 + $0x60] sm:$0xff]   ;;  %v4291_v56 = vld [vmem:[#allocation13 + $0x28] sm:$0xff]  }
 0x45c   :  { %4361 = vpow2.f32 %v3332_v54  ;;  %v4289_v54 = vld [vmem:[#allocation13 + $0x20] sm:$0xff]   ;;  %v4293_v58 = vld [vmem:[#allocation13 + $0x30] sm:$0xff]  }
 0x45d   :  { %4363 = vpow2.f32 %v3333_v57  ;;  %v4292_v57 = vld [vmem:[#allocation13 + $0x68] sm:$0xff]  }
 0x466   :  { %v4362_v59 = vpop.eup %4361 }
 0x467   :  { %v4364_v60 = vpop.eup %4363  ;;  %v2042_v61 = vadd.f32 1.0, %v4362_v59  ;;  %v4294_v59 = vld [vmem:[#allocation13 + $0x70] sm:$0xff]  }
 0x468   :  { %v2043_v62 = vadd.f32 1.0, %v4364_v60  ;;  %v4295_v60 = vld [vmem:[#allocation13 + $0x38] sm:$0xff]  }
 0x469   :  { %4365 = vrcp.f32 %v2042_v61  ;;  %v4296_v61 = vld [vmem:[#allocation13 + $0x78] sm:$0xff]  }
 0x46a   :  { %4367 = vrcp.f32 %v2043_v62  ;;  %v4297_v62 = vld [vmem:[#allocation13 + $0x80] sm:$0xff]  }
 0x473   :  { %v4366_v63 = vpop.eup %4365 }
 0x474   :  { %v4368_v1 = vpop.eup %4367  ;;  %v2054_v2 = vmul.f32 %v4366_v63, %v1761_v48  ;;  %v4283_v48 = vld [vmem:[#allocation13 + $0x8] sm:$0xff]   ;;  %v4298_v63 = vld [vmem:[#allocation13 + $0xc0] sm:$0xff]  }
 0x475   :  { %v2055_v3 = vmul.f32 %v4368_v1, %v1849_v51  ;;  %v4286_v51 = vld [vmem:[#allocation13 + $0x50] sm:$0xff]   ;;  %v4299_v1 = vld [vmem:[#allocation13 + $0x88] sm:$0xff]  }
 0x476   :  { %v5090_v6 = vpack.c.bf16 %v2054_v2, %v2054_v2  ;;  %v4300_v2 = vld [vmem:[#allocation13 + $0xc8] sm:$0xff]  }
 0x477   :  { %v5095_v9 = vpack.c.bf16 %v2055_v3, %v2055_v3  ;;  %v1936_v10 = vpop.f32.mrb[28].mxu0  ;;  %v4301_v3 = vld [vmem:[#allocation13 + $0x90] sm:$0xff]  }
 0x478   :  { %v5097_v11 = vadd.f32 %v3298_v4, %v1936_v10  ;;  %v2024_v12 = vpop.f32.mrb[28].mxu1  ;;  %v3924_v13 = vpop.f32.mrb[29].mxu0  ;;  %3963 = vmatmul.mubr.bf16.vlgmr.msra.gmra.mrb[32].mxu0 %v5090_v6  ;;  %v4302_v4 = vld [vmem:[#allocation13 + $0xd0] sm:$0xff]   ;;  %v4308_v10 = vld [vmem:[#allocation13 + $0xe8] sm:$0xff]  }
 0x479   :  { %v5100_v14 = vadd.f32 %v3299_v7, %v2024_v12  ;;  %v3944_v15 = vpop.f32.mrb[29].mxu1  ;;  %3983 = vmatmul.mubr.bf16.vlgmr.msra.gmra.mrb[32].mxu1 %v5095_v9  ;;  %3987 = vmatpush3.bf16.msra.mxu0 %v4265_v5  ;;  %v1939_v16 = vpop.f32.mrb[30].mxu0  ;;  %v4303_v5 = vld [vmem:[#allocation13 + $0x98] sm:$0xff]   ;;  %v4305_v7 = vld [vmem:[#allocation13 + $0xa0] sm:$0xff]   ;;  %v4310_v12 = vld [vmem:[#allocation13 + $0xf0] sm:$0xff]  }
 0x47a   :  { %v3334_v18 = vmul.f32 -1.442695, %v5097_v11  ;;  %4007 = vmatpush3.bf16.msra.mxu1 %v4266_v8  ;;  %v2027_v19 = vpop.f32.mrb[30].mxu1  ;;  %v3925_v20 = vpop.f32.mrb[31].mxu0  ;;  %3988 = vmatprep.subr.bf16.mxu0 %v4638_v0  ;;  %v4306_v8 = vld [vmem:[#allocation13 + $0xe0] sm:$0xff]   ;;  %v4311_v13 = vld [vmem:[#allocation13 + $0xb8] sm:$0xff]  }
 0x47b   :  { %v3335_v22 = vmul.f32 -1.442695, %v5100_v14  ;;  %v3945_v23 = vpop.f32.mrb[31].mxu1  ;;  %4008 = vmatprep.subr.bf16.mxu1 %v4638_v0  ;;  %4002 = vmatprep.mubr.msk.bf16.mxu0 %vm4639_vm0, %v4638_v0  ;;  %v3336_v15 = vld [vmem:[%s5293_s10] ss:$0 sm:$0xff] }
 0x47c   :  { %4369 = vpow2.f32 %v3334_v18  ;;  %4022 = vmatprep.mubr.msk.bf16.mxu1 %vm4639_vm0, %v4638_v0  ;;  %v3337_v16 = vld [vmem:[%s5293_s10 + $0x1] ss:$0 sm:$0xff] }
 0x47d   :  { %4371 = vpow2.f32 %v3335_v22  ;;  %3989 = vmatpush3.bf16.msra.mxu0 %v4267_v17 }
 0x47e   :  { %4009 = vmatpush3.bf16.msra.mxu1 %v4268_v21  ;;  %3990 = vmatprep.subr.bf16.mxu0 %v4638_v0 }
 0x47f   :  { %4010 = vmatprep.subr.bf16.mxu1 %v4638_v0 }
 0x481   :  { %3991 = vmatpush3.bf16.msra.mxu0 %v4269_v24 }
 0x482   :  { %4011 = vmatpush3.bf16.msra.mxu1 %v4270_v25  ;;  %3992 = vmatprep.subr.bf16.mxu0 %v4638_v0 }
 0x483   :  { %4012 = vmatprep.subr.bf16.mxu1 %v4638_v0 }
 0x485   :  { %3993 = vmatpush3.bf16.msra.mxu0 %v4271_v26  ;;  %v3338_v26 = vld [vmem:[%s5293_s10 + $0x2] ss:$0 sm:$0xff] }
 0x486   :  { %v4370_v29 = vpop.eup %4369  ;;  %4013 = vmatpush3.bf16.msra.mxu1 %v4272_v27  ;;  %3994 = vmatprep.subr.bf16.mxu0 %v4638_v0  ;;  %v3339_v27 = vld [vmem:[%s5293_s10 + $0x3] ss:$0 sm:$0xff] }
 0x487   :  { %v4372_v31 = vpop.eup %4371  ;;  %v2044_v32 = vadd.f32 1.0, %v4370_v29  ;;  %4014 = vmatprep.subr.bf16.mxu1 %v4638_v0 }
 0x488   :  { %v2045_v33 = vadd.f32 1.0, %v4372_v31 }
 0x489   :  { %4373 = vrcp.f32 %v2044_v32  ;;  %3995 = vmatpush3.bf16.msra.mxu0 %v4273_v28 }
 0x48a   :  { %4375 = vrcp.f32 %v2045_v33  ;;  %4015 = vmatpush3.bf16.msra.mxu1 %v4274_v30  ;;  %3996 = vmatprep.subr.bf16.mxu0 %v4638_v0 }
 0x48b   :  { %4016 = vmatprep.subr.bf16.mxu1 %v4638_v0 }
 0x48d   :  { %3997 = vmatpush3.bf16.msra.mxu0 %v4275_v34 }
 0x48e   :  { %4017 = vmatpush3.bf16.msra.mxu1 %v4276_v35  ;;  %3998 = vmatprep.subr.bf16.mxu0 %v4638_v0 }
 0x48f   :  { %4018 = vmatprep.subr.bf16.mxu1 %v4638_v0 }
 0x491   :  { %3999 = vmatpush3.bf16.msra.mxu0 %v4277_v36 }
 0x492   :  { %4019 = vmatpush3.bf16.msra.mxu1 %v4278_v37  ;;  %4000 = vmatprep.subr.bf16.mxu0 %v4638_v0 }
 0x493   :  { %v4374_v40 = vpop.eup %4373  ;;  %4020 = vmatprep.subr.bf16.mxu1 %v4638_v0 }
 0x494   :  { %v4376_v41 = vpop.eup %4375  ;;  %v2056_v42 = vmul.f32 %v4374_v40, %v5097_v11  ;;  %v4309_v11 = vld [vmem:[#allocation13 + $0xb0] sm:$0xff]  }
 0x495   :  { %v2057_v43 = vmul.f32 %v4376_v41, %v5100_v14  ;;  %4001 = vmatpush3.bf16.msra.mxu0 %v4279_v38  ;;  %v4312_v14 = vld [vmem:[#allocation13 + $0xf8] sm:$0xff]  }
 0x496   :  { %v5125_v45 = vpack.c.bf16 %v2056_v42, %v2056_v42  ;;  %4021 = vmatpush3.bf16.msra.mxu1 %v4280_v39  ;;  %4026 = vmatprep.subr.bf16.mxu0 %v4638_v0 }
 0x497   :  { %v5128_v47 = vpack.c.bf16 %v2057_v43, %v2057_v43  ;;  %4046 = vmatprep.subr.bf16.mxu1 %v4638_v0 }
 0x498   :  { %4003 = vmatmul.mubr.bf16.vlgmr.msra.gmra.mrb[36].mxu0 %v5125_v45 }
 0x499   :  { %4023 = vmatmul.mubr.bf16.vlgmr.msra.gmra.mrb[36].mxu1 %v5128_v47  ;;  %4027 = vmatpush3.bf16.msra.mxu0 %v4281_v44 }
 0x49a   :  { %4047 = vmatpush3.bf16.msra.mxu1 %v4282_v46  ;;  %4028 = vmatprep.subr.bf16.mxu0 %v4638_v0 }
 0x49b   :  { %4048 = vmatprep.subr.bf16.mxu1 %v4638_v0  ;;  %4042 = vmatprep.mubr.msk.bf16.mxu0 %vm4639_vm0, %v4638_v0 }
 0x49c   :  { %4062 = vmatprep.mubr.msk.bf16.mxu1 %vm4639_vm0, %v4638_v0 }
 0x49d   :  { %4029 = vmatpush3.bf16.msra.mxu0 %v4283_v48 }
 0x49e   :  { %4049 = vmatpush3.bf16.msra.mxu1 %v4284_v49  ;;  %4030 = vmatprep.subr.bf16.mxu0 %v4638_v0 }
 0x49f   :  { %4050 = vmatprep.subr.bf16.mxu1 %v4638_v0 }
 0x4a1   :  { %4031 = vmatpush3.bf16.msra.mxu0 %v4285_v50 }
 0x4a2   :  { %4051 = vmatpush3.bf16.msra.mxu1 %v4286_v51  ;;  %4032 = vmatprep.subr.bf16.mxu0 %v4638_v0 }
 0x4a3   :  { %4052 = vmatprep.subr.bf16.mxu1 %v4638_v0 }
 0x4a5   :  { %4033 = vmatpush3.bf16.msra.mxu0 %v4287_v52 }
 0x4a6   :  { %4053 = vmatpush3.bf16.msra.mxu1 %v4288_v53  ;;  %4034 = vmatprep.subr.bf16.mxu0 %v4638_v0 }
 0x4a7   :  { %4054 = vmatprep.subr.bf16.mxu1 %v4638_v0 }
 0x4a9   :  { %4035 = vmatpush3.bf16.msra.mxu0 %v4289_v54 }
 0x4aa   :  { %4055 = vmatpush3.bf16.msra.mxu1 %v4290_v55  ;;  %4036 = vmatprep.subr.bf16.mxu0 %v4638_v0 }
 0x4ab   :  { %4056 = vmatprep.subr.bf16.mxu1 %v4638_v0 }
 0x4ad   :  { %4037 = vmatpush3.bf16.msra.mxu0 %v4291_v56 }
 0x4ae   :  { %4057 = vmatpush3.bf16.msra.mxu1 %v4292_v57  ;;  %4038 = vmatprep.subr.bf16.mxu0 %v4638_v0 }
 0x4af   :  { %4058 = vmatprep.subr.bf16.mxu1 %v4638_v0 }
 0x4b1   :  { %4039 = vmatpush3.bf16.msra.mxu0 %v4293_v58 }
 0x4b2   :  { %4059 = vmatpush3.bf16.msra.mxu1 %v4294_v59  ;;  %4040 = vmatprep.subr.bf16.mxu0 %v4638_v0 }
 0x4b3   :  { %4060 = vmatprep.subr.bf16.mxu1 %v4638_v0 }
 0x4b5   :  { %4041 = vmatpush3.bf16.msra.mxu0 %v4295_v60 }
 0x4b6   :  { %4061 = vmatpush3.bf16.msra.mxu1 %v4296_v61  ;;  %4066 = vmatprep.subr.bf16.mxu0 %v4638_v0 }
 0x4b7   :  { %4086 = vmatprep.subr.bf16.mxu1 %v4638_v0 }
 0x4b8   :  { %4043 = vmatmul.mubr.bf16.vlgmr.msra.gmra.mrb[40].mxu0 %v5090_v6  ;;  %v4304_v6 = vld [vmem:[#allocation13 + $0xd8] sm:$0xff]  }
 0x4b9   :  { %4063 = vmatmul.mubr.bf16.vlgmr.msra.gmra.mrb[40].mxu1 %v5095_v9  ;;  %4067 = vmatpush3.bf16.msra.mxu0 %v4297_v62  ;;  %v4307_v9 = vld [vmem:[#allocation13 + $0xa8] sm:$0xff]  }
 0x4ba   :  { %4087 = vmatpush3.bf16.msra.mxu1 %v4298_v63  ;;  %4068 = vmatprep.subr.bf16.mxu0 %v4638_v0 }
 0x4bb   :  { %4088 = vmatprep.subr.bf16.mxu1 %v4638_v0  ;;  %4082 = vmatprep.mubr.msk.bf16.mxu0 %vm4639_vm0, %v4638_v0 }
 0x4bc   :  { %4102 = vmatprep.mubr.msk.bf16.mxu1 %vm4639_vm0, %v4638_v0 }
 0x4bd   :  { %4069 = vmatpush3.bf16.msra.mxu0 %v4299_v1 }
 0x4be   :  { %4089 = vmatpush3.bf16.msra.mxu1 %v4300_v2  ;;  %4070 = vmatprep.subr.bf16.mxu0 %v4638_v0 }
 0x4bf   :  { %4090 = vmatprep.subr.bf16.mxu1 %v4638_v0 }
 0x4c1   :  { %4071 = vmatpush3.bf16.msra.mxu0 %v4301_v3 }
 0x4c2   :  { %4091 = vmatpush3.bf16.msra.mxu1 %v4302_v4  ;;  %4072 = vmatprep.subr.bf16.mxu0 %v4638_v0 }
 0x4c3   :  { %4092 = vmatprep.subr.bf16.mxu1 %v4638_v0 }
 0x4c5   :  { %4073 = vmatpush3.bf16.msra.mxu0 %v4303_v5 }
 0x4c6   :  { %4093 = vmatpush3.bf16.msra.mxu1 %v4304_v6  ;;  %4074 = vmatprep.subr.bf16.mxu0 %v4638_v0 }
 0x4c7   :  { %4094 = vmatprep.subr.bf16.mxu1 %v4638_v0 }
 0x4c9   :  { %4075 = vmatpush3.bf16.msra.mxu0 %v4305_v7 }
 0x4ca   :  { %4095 = vmatpush3.bf16.msra.mxu1 %v4306_v8  ;;  %4076 = vmatprep.subr.bf16.mxu0 %v4638_v0 }
 0x4cb   :  { %4096 = vmatprep.subr.bf16.mxu1 %v4638_v0 }
 0x4cd   :  { %4077 = vmatpush3.bf16.msra.mxu0 %v4307_v9 }
 0x4ce   :  { %4097 = vmatpush3.bf16.msra.mxu1 %v4308_v10  ;;  %4078 = vmatprep.subr.bf16.mxu0 %v4638_v0 }
 0x4cf   :  { %4098 = vmatprep.subr.bf16.mxu1 %v4638_v0 }
 0x4d1   :  { %4079 = vmatpush3.bf16.msra.mxu0 %v4309_v11 }
 0x4d2   :  { %4099 = vmatpush3.bf16.msra.mxu1 %v4310_v12  ;;  %4080 = vmatprep.subr.bf16.mxu0 %v4638_v0 }
 0x4d3   :  { %4100 = vmatprep.subr.bf16.mxu1 %v4638_v0 }
 0x4d5   :  { %4081 = vmatpush3.bf16.msra.mxu0 %v4311_v13 }
 0x4d6   :  { %4101 = vmatpush3.bf16.msra.mxu1 %v4312_v14 }
 0x4d8   :  { %4083 = vmatmul.mubr.bf16.vlgmr.msra.gmra.mrb[44].mxu0 %v5125_v45 }
 0x4d9   :  { %4103 = vmatmul.mubr.bf16.vlgmr.msra.gmra.mrb[44].mxu1 %v5128_v47 }
 0x54b   :  { %v2236_v17 = vpop.f32.mrb[32].mxu0 }
 0x54c   :  { %v2237_v18 = vadd.f32 %v3336_v15, %v2236_v17  ;;  %v2324_v19 = vpop.f32.mrb[32].mxu1  ;;  %v3964_v20 = vpop.f32.mrb[33].mxu0 }
 0x54d   :  { %v2325_v21 = vadd.f32 %v3337_v16, %v2324_v19  ;;  %v3984_v0 = vpop.f32.mrb[33].mxu1  ;;  %v2239_v22 = vpop.f32.mrb[34].mxu0 }
 0x54e   :  { %3124 = vst [vmem:[#allocation14] sm:$0xff] %v2237_v18  ;;  %v2327_v23 = vpop.f32.mrb[34].mxu1  ;;  %v3965_v24 = vpop.f32.mrb[35].mxu0 }
 0x54f   :  { %3125 = vst [vmem:[#allocation14 + $0x8] sm:$0xff] %v2325_v21  ;;  %v3985_v25 = vpop.f32.mrb[35].mxu1 }
 0x56b   :  { %v2412_v28 = vpop.f32.mrb[36].mxu0 }
 0x56c   :  { %v2413_v29 = vadd.f32 %v3338_v26, %v2412_v28  ;;  %v2500_v30 = vpop.f32.mrb[36].mxu1  ;;  %v4004_v31 = vpop.f32.mrb[37].mxu0 }
 0x56d   :  { %v2501_v32 = vadd.f32 %v3339_v27, %v2500_v30  ;;  %v4024_v33 = vpop.f32.mrb[37].mxu1  ;;  %v2415_v34 = vpop.f32.mrb[38].mxu0 }
 0x56e   :  { %3126 = vst [vmem:[#allocation14 + $0x10] sm:$0xff] %v2413_v29  ;;  %v2503_v35 = vpop.f32.mrb[38].mxu1  ;;  %v4005_v36 = vpop.f32.mrb[39].mxu0 }
 0x56f   :  { %3127 = vst [vmem:[#allocation14 + $0x18] sm:$0xff] %v2501_v32  ;;  %v4025_v37 = vpop.f32.mrb[39].mxu1 }
 0x570   :  { %4582 = shalt.err (!%p4579_p4)
}
 0x571   :  { %s4583_s7 = scalar_lea.hbm %s5298_s15, 512 }
 0x572   :  { %p4584_p5 = scmp.ne.s32.totalorder %s5298_s15, %s4583_s7  ;;  %p4587_p6 = scmp.lt.u32.totalorder %s4583_s7, %s5298_s15 }
 0x574   :  { %p4589_p7 = pnand %p4587_p6, %p4584_p5 }
 0x576   :  { %4592 = shalt.err (!%p4589_p7)
}
 0x577   :  { %3151 = dma.vmem_to_hbm [thread:$0]  %s3146_s29, 512, %s5298_s15, [#allocation4], %s4633_s9, %s4633_s9, %s4634_s24  }
 0x578   :  { %v3372_v38 = vld [vmem:[%s5295_s12] ss:$0 sm:$0xff]  ;;  %v3373_v39 = vld [vmem:[%s5295_s12 + $0x1] ss:$0 sm:$0xff]  ;;  %v3374_v2 = vld [vmem:[%s5295_s12 + $0x2] ss:$0 sm:$0xff] }
 0x579   :  { %v5211_v41 = vld [vmem:[%s5296_s13] ss:$0 sm:$0xff]  ;;  %v3375_v4 = vld [vmem:[%s5295_s12 + $0x3] ss:$0 sm:$0xff] }
 0x57a   :  { %v5232_v34 = vld [vmem:[%s5297_s14] ss:$0 sm:$0xff]  ;;  %s4641_s14 = smov [#allocation15]  }
 0x57b   :  { %s3157_s18 = sshll.u32 %s4641_s14, 4  ;;  %s3158_s18 = int_to_ptr.vmem [resolvable:$true] %s3157_s18 }
 0x57c   :  { %s4593_s27 = scalar_lea.vmem %s3158_s18, 512  ;;  %p4598_p9 = scmp.lt.s32.totalorder %s3158_s18, %s3158_s18 }
 0x57d   :  { %p4594_p8 = scmp.ne.s32.totalorder %s3158_s18, %s4593_s27  ;;  %p4599_p10 = scmp.lt.s32.totalorder %s4593_s27, %s4593_s27 }
 0x57f   :  { %p4600_p11 = por %p4599_p10, %p4598_p9 }
 0x581   :  { %p4601_p12 = pnand %p4600_p11, %p4594_p8 }
 0x58b   :  { %v2680_v40 = vpop.f32.mrb[40].mxu0 }
 0x58c   :  { %v2681_v42 = vadd.f32 %v3372_v38, %v2680_v40  ;;  %v2768_v43 = vpop.f32.mrb[40].mxu1  ;;  %v4044_v44 = vpop.f32.mrb[41].mxu0 }
 0x58d   :  { %v2769_v45 = vadd.f32 %v3373_v39, %v2768_v43  ;;  %v4064_v46 = vpop.f32.mrb[41].mxu1  ;;  %v2683_v47 = vpop.f32.mrb[42].mxu0 }
 0x58e   :  { %v2958_v48 = vsub.f32 %v5211_v41, %v2681_v42  ;;  %v2771_v49 = vpop.f32.mrb[42].mxu1  ;;  %v4045_v50 = vpop.f32.mrb[43].mxu0 }
 0x58f   :  { %v2959_v51 = vsub.f32 %v5211_v41, %v2769_v45  ;;  %v4065_v52 = vpop.f32.mrb[43].mxu1 }
 0x590   :  { %v2974_v53 = vand.u32 2147483647, %v2958_v48  ;;  %v2962_v17 = vmax.f32 %v2958_v48, 0.0  ;;  %vm2966_vm3 = vcmp.ne.f32.partialorder %v2958_v48, %v2958_v48 }
 0x591   :  { %v2975_v54 = vand.u32 2147483647, %v2959_v51  ;;  %v2963_v27 = vmax.f32 %v2959_v51, 0.0  ;;  %vm2967_vm4 = vcmp.ne.f32.partialorder %v2959_v51, %v2959_v51 }
 0x592   :  { %v2978_v55 = vsub.f32 0.0, %v2974_v53 }
 0x593   :  { %v2979_v56 = vsub.f32 0.0, %v2975_v54 }
 0x594   :  { %v2982_v57 = vmul.f32 1.442695, %v2978_v55 }
 0x595   :  { %v2984_v58 = vmul.f32 1.442695, %v2979_v56 }
 0x596   :  { %4377 = vpow2.f32 %v2982_v57 }
 0x597   :  { %4379 = vpow2.f32 %v2984_v58 }
 0x5a0   :  { %v4378_v59 = vpop.eup %4377 }
 0x5a1   :  { %v4380_v60 = vpop.eup %4379  ;;  %v2990_v61 = vadd.f32 1.0, %v4378_v59  ;;  %v2993_v63 = vmul.f32 -0.5, %v4378_v59  ;;  %v2996_v5 = vand.u32 2147483647, %v4378_v59 }
 0x5a2   :  { %v2999_v62 = vadd.f32 1.0, %v4380_v60  ;;  %v3002_v1 = vmul.f32 -0.5, %v4380_v60  ;;  %v3005_v8 = vand.u32 2147483647, %v4380_v60 }
 0x5a3   :  { %4381 = vlog2.f32 %v2990_v61  ;;  %v2994_v3 = vadd.f32 1.0, %v2993_v63  ;;  %vm2997_vm1 = vcmp.lt.f32.partialorder %v2996_v5, 0.0004427343 }
 0x5a4   :  { %4383 = vlog2.f32 %v2999_v62  ;;  %v3003_v6 = vadd.f32 1.0, %v3002_v1  ;;  %vm3006_vm2 = vcmp.lt.f32.partialorder %v3005_v8, 0.0004427343 }
 0x5a5   :  { %v2995_v19 = vmul.f32 %v4378_v59, %v2994_v3 }
 0x5a6   :  { %v3004_v23 = vmul.f32 %v4380_v60, %v3003_v6 }
 0x5ab   :  { %v2856_v7 = vpop.f32.mrb[44].mxu0 }
 0x5ac   :  { %v2857_v9 = vadd.f32 %v3374_v2, %v2856_v7  ;;  %v2944_v10 = vpop.f32.mrb[44].mxu1  ;;  %v4084_v11 = vpop.f32.mrb[45].mxu0 }
 0x5ad   :  { %v4382_v12 = vpop.eup %4381  ;;  %v2945_v13 = vadd.f32 %v3375_v4, %v2944_v10  ;;  %v4104_v14 = vpop.f32.mrb[45].mxu1 }
 0x5ae   :  { %v2859_v15 = vpop.f32.mrb[46].mxu0  ;;  %v4384_v16 = vpop.eup %4383  ;;  %v2992_v18 = vmul.f32 0.6931472, %v4382_v12  ;;  %v5222_v20 = vsub.f32 %v5211_v41, %v2857_v9 }
 0x5af   :  { %v2947_v21 = vpop.f32.mrb[46].mxu1  ;;  %v4085_v0 = vpop.f32.mrb[47].mxu0  ;;  %v3001_v22 = vmul.f32 0.6931472, %v4384_v16  ;;  %v5225_v24 = vsub.f32 %v5211_v41, %v2945_v13 }
 0x5b0   :  { %v4105_v25 = vpop.f32.mrb[47].mxu1  ;;  %v2998_v26 = vsel %vm2997_vm1, %v2995_v19, %v2992_v18  ;;  %v2976_v28 = vand.u32 2147483647, %v5222_v20  ;;  %v2964_v8 = vmax.f32 %v5222_v20, 0.0  ;;  %vm2968_vm7 = vcmp.ne.f32.partialorder %v5222_v20, %v5222_v20 }
 0x5b1   :  { %v3026_v29 = vadd.f32 %v2998_v26, %v2962_v17  ;;  %v3007_v30 = vsel %vm3006_vm2, %v3004_v23, %v3001_v22  ;;  %v2977_v33 = vand.u32 2147483647, %v5225_v24  ;;  %v2965_v13 = vmax.f32 %v5225_v24, 0.0 }
 0x5b2   :  { %v3027_v31 = vadd.f32 %v3007_v30, %v2963_v27  ;;  %v2980_v32 = vsub.f32 0.0, %v2976_v28  ;;  %vm2969_vm8 = vcmp.ne.f32.partialorder %v5225_v24, %v5225_v24 }
 0x5b3   :  { %v3030_v35 = vsel %vm2966_vm3, %v2958_v48, %v3026_v29  ;;  %v2981_v39 = vsub.f32 0.0, %v2977_v33 }
 0x5b4   :  { %v3034_v36 = vsub.f32 %v5211_v41, %v3030_v35  ;;  %v3031_v37 = vsel %vm2967_vm4, %v2959_v51, %v3027_v31  ;;  %v2986_v38 = vmul.f32 1.442695, %v2980_v32 }
 0x5b5   :  { %v3035_v40 = vsub.f32 %v5211_v41, %v3031_v37  ;;  %v2988_v43 = vmul.f32 1.442695, %v2981_v39 }
 0x5b6   :  { %v5237_v42 = vsub.f32 %v3034_v36, %v5232_v34  ;;  %4385 = vpow2.f32 %v2986_v38 }
 0x5b7   :  { %v5240_v44 = vsub.f32 %v3035_v40, %v5232_v34  ;;  %4387 = vpow2.f32 %v2988_v43 }
 0x5b8   :  { %v3060_v45 = vand.u32 2147483647, %v5237_v42  ;;  %v3048_v30 = vmax.f32 %v5237_v42, 0.0  ;;  %vm3052_vm11 = vcmp.ne.f32.partialorder %v5237_v42, %v5237_v42 }
 0x5b9   :  { %v3061_v46 = vand.u32 2147483647, %v5240_v44  ;;  %v3049_v33 = vmax.f32 %v5240_v44, 0.0  ;;  %vm3053_vm12 = vcmp.ne.f32.partialorder %v5240_v44, %v5240_v44 }
 0x5ba   :  { %v3064_v47 = vsub.f32 0.0, %v3060_v45 }
 0x5bb   :  { %v3065_v48 = vsub.f32 0.0, %v3061_v46 }
 0x5bc   :  { %v3068_v49 = vmul.f32 1.442695, %v3064_v47 }
 0x5bd   :  { %v3070_v50 = vmul.f32 1.442695, %v3065_v48 }
 0x5be   :  { %4389 = vpow2.f32 %v3068_v49 }
 0x5bf   :  { %4391 = vpow2.f32 %v3070_v50 }
 0x5c0   :  { %v4386_v51 = vpop.eup %4385 }
 0x5c1   :  { %v3008_v52 = vadd.f32 1.0, %v4386_v51  ;;  %v4388_v53 = vpop.eup %4387  ;;  %v3011_v55 = vmul.f32 -0.5, %v4386_v51  ;;  %v3014_v62 = vand.u32 2147483647, %v4386_v51 }
 0x5c2   :  { %v3017_v54 = vadd.f32 1.0, %v4388_v53  ;;  %v3020_v57 = vmul.f32 -0.5, %v4388_v53  ;;  %v3023_v2 = vand.u32 2147483647, %v4388_v53 }
 0x5c3   :  { %4393 = vlog2.f32 %v3008_v52  ;;  %v3012_v61 = vadd.f32 1.0, %v3011_v55  ;;  %vm3015_vm5 = vcmp.lt.f32.partialorder %v3014_v62, 0.0004427343 }
 0x5c4   :  { %4395 = vlog2.f32 %v3017_v54  ;;  %v3021_v63 = vadd.f32 1.0, %v3020_v57  ;;  %vm3024_vm6 = vcmp.lt.f32.partialorder %v3023_v2, 0.0004427343 }
 0x5c5   :  { %v3013_v5 = vmul.f32 %v4386_v51, %v3012_v61 }
 0x5c6   :  { %v3022_v11 = vmul.f32 %v4388_v53, %v3021_v63 }
 0x5c8   :  { %v4390_v56 = vpop.eup %4389 }
 0x5c9   :  { %v4392_v58 = vpop.eup %4391  ;;  %v3076_v59 = vadd.f32 1.0, %v4390_v56  ;;  %v3079_v3 = vmul.f32 -0.5, %v4390_v56  ;;  %v3082_v16 = vand.u32 2147483647, %v4390_v56 }
 0x5ca   :  { %v3085_v60 = vadd.f32 1.0, %v4392_v58  ;;  %v3088_v7 = vmul.f32 -0.5, %v4392_v58  ;;  %v3091_v21 = vand.u32 2147483647, %v4392_v58 }
 0x5cb   :  { %4397 = vlog2.f32 %v3076_v59  ;;  %v3080_v14 = vadd.f32 1.0, %v3079_v3  ;;  %vm3083_vm9 = vcmp.lt.f32.partialorder %v3082_v16, 0.0004427343 }
 0x5cc   :  { %4399 = vlog2.f32 %v3085_v60  ;;  %v3089_v17 = vadd.f32 1.0, %v3088_v7  ;;  %vm3092_vm10 = vcmp.lt.f32.partialorder %v3091_v21, 0.0004427343 }
 0x5cd   :  { %v4394_v1 = vpop.eup %4393  ;;  %v3081_v27 = vmul.f32 %v4390_v56, %v3080_v14 }
 0x5ce   :  { %v3010_v4 = vmul.f32 0.6931472, %v4394_v1  ;;  %v4396_v6 = vpop.eup %4395  ;;  %v3090_v31 = vmul.f32 %v4392_v58, %v3089_v17 }
 0x5cf   :  { %v3019_v10 = vmul.f32 0.6931472, %v4396_v6 }
 0x5d0   :  { %v3016_v9 = vsel %vm3015_vm5, %v3013_v5, %v3010_v4 }
 0x5d1   :  { %v3028_v12 = vadd.f32 %v3016_v9, %v2964_v8  ;;  %v3025_v15 = vsel %vm3024_vm6, %v3022_v11, %v3019_v10 }
 0x5d2   :  { %v3029_v19 = vadd.f32 %v3025_v15, %v2965_v13 }
 0x5d3   :  { %v3032_v18 = vsel %vm2968_vm7, %v5222_v20, %v3028_v12 }
 0x5d4   :  { %v3036_v0 = vsub.f32 %v5211_v41, %v3032_v18  ;;  %v3033_v23 = vsel %vm2969_vm8, %v5225_v24, %v3029_v19 }
 0x5d5   :  { %v4398_v22 = vpop.eup %4397  ;;  %v3037_v29 = vsub.f32 %v5211_v41, %v3033_v23 }
 0x5d6   :  { %v4400_v25 = vpop.eup %4399  ;;  %v3078_v26 = vmul.f32 0.6931472, %v4398_v22  ;;  %v3046_v28 = vsub.f32 %v3036_v0, %v5232_v34 }
 0x5d7   :  { %v3087_v20 = vmul.f32 0.6931472, %v4400_v25  ;;  %v3047_v24 = vsub.f32 %v3037_v29, %v5232_v34 }
 0x5d8   :  { %v3084_v32 = vsel %vm3083_vm9, %v3081_v27, %v3078_v26  ;;  %v3062_v35 = vand.u32 2147483647, %v3046_v28  ;;  %v3050_v2 = vmax.f32 %v3046_v28, 0.0  ;;  %vm3054_vm14 = vcmp.ne.f32.partialorder %v3046_v28, %v3046_v28 }
 0x5d9   :  { %v3112_v36 = vadd.f32 %v3084_v32, %v3048_v30  ;;  %v3093_v37 = vsel %vm3092_vm10, %v3090_v31, %v3087_v20  ;;  %v3063_v41 = vand.u32 2147483647, %v3047_v24  ;;  %v3051_v8 = vmax.f32 %v3047_v24, 0.0 }
 0x5da   :  { %v3113_v38 = vadd.f32 %v3093_v37, %v3049_v33  ;;  %v3066_v39 = vsub.f32 0.0, %v3062_v35  ;;  %vm3055_vm0 = vcmp.ne.f32.partialorder %v3047_v24, %v3047_v24 }
 0x5db   :  { %v3116_v40 = vsel %vm3052_vm11, %v5237_v42, %v3112_v36  ;;  %v3067_v47 = vsub.f32 0.0, %v3063_v41 }
 0x5dc   :  { %v3072_v43 = vmul.f32 1.442695, %v3066_v39  ;;  %v3117_v45 = vsel %vm3053_vm12, %v5240_v44, %v3113_v38  ;;  %v3120_v46 = vadd.f32 %v5232_v34, %v3116_v40 }
 0x5dd   :  { %v3121_v48 = vadd.f32 %v5232_v34, %v3117_v45  ;;  %v3074_v50 = vmul.f32 1.442695, %v3067_v47 }
 0x5de   :  { %4401 = vpow2.f32 %v3072_v43  ;;  %v3128_v49 = vmul.f32 1.442695, %v3120_v46 }
 0x5df   :  { %v3130_v51 = vmul.f32 1.442695, %v3121_v48 }
 0x5e0   :  { %4403 = vpow2.f32 %v3128_v49 }
 0x5e1   :  { %4405 = vpow2.f32 %v3074_v50 }
 0x5e2   :  { %4407 = vpow2.f32 %v3130_v51 }
 0x5e8   :  { %v4402_v52 = vpop.eup %4401 }
 0x5e9   :  { %v3094_v53 = vadd.f32 1.0, %v4402_v52  ;;  %v3097_v56 = vmul.f32 -0.5, %v4402_v52  ;;  %v3100_v59 = vand.u32 2147483647, %v4402_v52 }
 0x5ea   :  { %v4404_v54 = vpop.eup %4403 }
 0x5eb   :  { %v4406_v55 = vpop.eup %4405  ;;  %4409 = vlog2.f32 %v3094_v53  ;;  %3136 = vst [vmem:[#allocation15] sm:$0xff] %v4404_v54  ;;  %v3098_v58 = vadd.f32 1.0, %v3097_v56  ;;  %vm3101_vm13 = vcmp.lt.f32.partialorder %v3100_v59, 0.0004427343 }
 0x5ec   :  { %v4408_v42 = vpop.eup %4407  ;;  %v3103_v44 = vadd.f32 1.0, %v4406_v55  ;;  %v3106_v57 = vmul.f32 -0.5, %v4406_v55  ;;  %v3109_v1 = vand.u32 2147483647, %v4406_v55 }
 0x5ed   :  { %3137 = vst [vmem:[#allocation15 + $0x8] sm:$0xff] %v4408_v42  ;;  %v3099_v63 = vmul.f32 %v4402_v52, %v3098_v58 }
 0x5ee   :  { %4411 = vlog2.f32 %v3103_v44  ;;  %v3107_v61 = vadd.f32 1.0, %v3106_v57  ;;  %vm3110_vm15 = vcmp.lt.f32.partialorder %v3109_v1, 0.0004427343 }
 0x5f0   :  { %v3108_v7 = vmul.f32 %v4406_v55, %v3107_v61 }
 0x5f5   :  { %v4410_v60 = vpop.eup %4409 }
 0x5f6   :  { %v3096_v62 = vmul.f32 0.6931472, %v4410_v60 }
 0x5f8   :  { %v4412_v3 = vpop.eup %4411  ;;  %v3102_v4 = vsel %vm3101_vm13, %v3099_v63, %v3096_v62 }
 0x5f9   :  { %v3114_v5 = vadd.f32 %v3102_v4, %v3050_v2  ;;  %v3105_v6 = vmul.f32 0.6931472, %v4412_v3 }
 0x5fb   :  { %v3111_v9 = vsel %vm3110_vm15, %v3108_v7, %v3105_v6  ;;  %v3118_v10 = vsel %vm3054_vm14, %v3046_v28, %v3114_v5 }
 0x5fc   :  { %v3115_v11 = vadd.f32 %v3111_v9, %v3051_v8  ;;  %v3122_v12 = vadd.f32 %v5232_v34, %v3118_v10 }
 0x5fe   :  { %v3119_v13 = vsel %vm3055_vm0, %v3047_v24, %v3115_v11  ;;  %v3132_v14 = vmul.f32 1.442695, %v3122_v12 }
 0x5ff   :  { %v3123_v15 = vadd.f32 %v5232_v34, %v3119_v13 }
 0x600   :  { %4413 = vpow2.f32 %v3132_v14 }
 0x601   :  { %v3134_v16 = vmul.f32 1.442695, %v3123_v15 }
 0x603   :  { %4415 = vpow2.f32 %v3134_v16 }
 0x60a   :  { %v4414_v17 = vpop.eup %4413 }
 0x60b   :  { %3138 = vst [vmem:[#allocation15 + $0x10] sm:$0xff] %v4414_v17 }
 0x60d   :  { %v4416_v18 = vpop.eup %4415 }
 0x60e   :  { %3139 = vst [vmem:[#allocation15 + $0x18] sm:$0xff] %v4416_v18 }
 0x60f   :  { %4604 = shalt.err (!%p4601_p12)
}
 0x610   :  { %s5305_s4 = sld [smem:[#allocation24_spill]] }
 0x616   :  { %s4605_s29 = scalar_lea.hbm %s5305_s4, 512 }
 0x617   :  { %p4606_p13 = scmp.ne.s32.totalorder %s5305_s4, %s4605_s29  ;;  %p4609_p0 = scmp.lt.u32.totalorder %s4605_s29, %s5305_s4 }
 0x619   :  { %p4611_p1 = pnand %p4609_p0, %p4606_p13 }
 0x61b   :  { %4614 = shalt.err (!%p4611_p1)
}
 0x61c   :  { %3163 = dma.vmem_to_hbm [thread:$0]  %s3158_s18, 512, %s5305_s4, [#allocation16], %s4633_s9, %s4633_s9, %s4634_s24  }
 0x61d   :  { %4623 = dma.done.wait [#allocation4], 512  }
 0x61e   :  { %4624 = vsyncadd [#allocation4], 4294966784 }
 0x61f   :  { %4625 = dma.done.wait [#allocation16], 512  }
 0x620   :  { %4626 = vsyncadd [#allocation16], 4294966784 }
 0x621   :  { %3170 = vsyncpa [#allocation3], 1 }
 0x622   :  { %3171 = vsyncpa [#allocation6], 1 }
 0x623   :  { %3172 = vsyncpa [#allocation9], 1 }
 0x624   :  { %3173 = vsyncpa [#allocation12], 1 }
 0x625   :  { %3174 = vsyncpa [#allocation4], 1 }
 0x626   :  { %3175 = vsyncpa [#allocation16], 1 }

</bundles_post_ra>
